<compile_context>
chip_gen: v6e
topology: v6e:2x2x1
jax: 0.10.0
libtpu: 0.0.40
codegen_flags: <defaults>
</compile_context>

<pallas_src>
import functools

import jax
import jax.numpy as jnp
from jax import lax
from jax.experimental import pallas as pl
from jax.experimental.pallas import tpu as pltpu

EPS = 1e-5


def _banded_weight(w, w_out, w_in, offset, dil):
    """Expand conv weights (KH,KW,Cin,Cout) into per-kh banded matrices.

    Returns M of shape (KH, w_in*Cin, w_out*Cout) with
      M[kh, p*Cin+ci, w*Cout+co] = w[kh, kw, ci, co]  iff  p == w + offset + dil*kw
    so that  out_row = sum_kh  x_row_slab(kh) @ M[kh]  implements the conv,
    with the kw and channel axes fused into the matmul K dimension.
    """
    kh, kw, cin, cout = w.shape
    j = jnp.arange(kw)[:, None, None]
    pcol = jnp.arange(w_in)[None, :, None]
    wcol = jnp.arange(w_out)[None, None, :]
    sel = (pcol == wcol + offset + dil * j).astype(w.dtype)       # (KW, Win, Wout)
    m = jnp.einsum("jpw,kjio->kpiwo", sel, w)                     # (KH,Win,Cin,Wout,Cout)
    return m.reshape(kh, w_in * cin, w_out * cout)


def _lka_kernel(x_ref, m1_ref, b1_ref, a1_ref, m2_ref, b2_ref, a2_ref,
                o_ref, pad_ref, *, l_off):
    # x_ref  : (1, H+4, (W+4)*Cin)   f32, lane-dense padded input
    # m1_ref : (5, (W+4)*Cin, W*Cout)   bf16 banded BN-folded conv1 weights
    # m2_ref : (7, PW, W*Cout)          bf16 banded BN-folded conv2 weights
    # b1/b2  : (1, W*Cout)              f32 biases tiled across w
    # a1/a2  : (1,) f32 in SMEM         PReLU slopes
    # pad_ref: (H+18, PW) f32 scratch holding conv1 output with a zero halo
    # o_ref  : (1, H, W*Cout)
    _, H, WC = o_ref.shape
    PW = pad_ref.shape[1]

    # ---- Conv 5x5, pad 2: 5 banded MXU matmuls (K = (W+4)*Cin, N = W*Cout).
    acc = jnp.zeros((H, WC), jnp.float32)
    for kh in range(5):
        lhs = x_ref[0, kh:kh + H, :].astype(jnp.bfloat16)
        acc = acc + jnp.dot(lhs, m1_ref[kh],
                            preferred_element_type=jnp.float32)
    y1 = acc + b1_ref[...]
    a1 = a1_ref[0]
    y1 = jnp.where(y1 >= 0.0, y1, a1 * y1)          # PReLU (shared scalar)

    # ---- Stage conv1 output into the lane-dense zero-padded scratch.
    # Only the halo strips are zeroed (interior is overwritten below).  This is
    # done every step (not just program_id==0) so the kernel stays correct when
    # the batch axis is split across TensorCores with "parallel" semantics.
    zrow = jnp.zeros((9, PW), jnp.float32)
    pad_ref[0:9, :] = zrow
    pad_ref[9 + H:18 + H, :] = zrow
    pad_ref[9:9 + H, 0:l_off] = jnp.zeros((H, l_off), jnp.float32)
    pad_ref[9:9 + H, l_off + WC:PW] = jnp.zeros((H, PW - l_off - WC),
                                                jnp.float32)
    pad_ref[9:9 + H, l_off:l_off + WC] = y1

    # ---- Conv 7x7, dilation 3, pad 9: 7 banded MXU matmuls (K = PW).
    acc2 = jnp.zeros((H, WC), jnp.float32)
    for kh in range(7):
        lhs = pad_ref[3 * kh:3 * kh + H, :].astype(jnp.bfloat16)
        acc2 = acc2 + jnp.dot(lhs, m2_ref[kh],
                              preferred_element_type=jnp.float32)
    y2 = acc2 + b2_ref[...]
    a2 = a2_ref[0]
    y2 = jnp.where(y2 >= 0.0, y2, a2 * y2)

    o_ref[0] = y2.astype(o_ref.dtype)                # lane-dense (H, W*Cout) store


def lka_forward(x_nchw, p):
    """Pallas LKA forward. x_nchw: (N, Cin, H, W) float32 -> (N, Cout, H, W)."""
    N, C_in, H, W = x_nchw.shape
    C_out = p["w1"].shape[-1]

    # Fold eval-mode BatchNorm into conv weights / biases.
    s1 = p["g1"] / jnp.sqrt(p["v1"] + EPS)
    w1 = p["w1"] * s1                                  # (5,5,Cin,Cout) * (Cout,)
    b1 = (p["b1"] - p["m1"]) * s1 + p["be1"]
    s2 = p["g2"] / jnp.sqrt(p["v2"] + EPS)
    w2 = p["w2"] * s2
    b2 = (p["b2"] - p["m2"]) * s2 + p["be2"]

    # NCHW -> lane-dense, spatially padded (pad=2 for the 5x5 "same" conv).
    x = jnp.transpose(x_nchw, (0, 2, 3, 1))
    x_pad = jnp.pad(x, ((0, 0), (2, 2), (2, 2), (0, 0)))
    x2d = x_pad.reshape(N, H + 4, (W + 4) * C_in)

    # Scratch geometry for the dilated conv.  Left pad >= 9 pixels, bumped up
    # so the interior starts at a 128-lane-aligned offset; total width rounded
    # so the scratch row is a whole number of vregs.
    l_pix = 9
    for cand in range(9, 9 + 128):
        if (cand * C_out) % 128 == 0:
            l_pix = cand
            break
    total_pix = l_pix + W + 9
    while (total_pix * C_out) % 128 != 0:
        total_pix += 1
    l_off = l_pix * C_out
    pw = total_pix * C_out

    # Banded ("implicit im2col") weight matrices, bf16 for the MXU.
    m1 = _banded_weight(w1, W, W + 4, offset=0, dil=1).astype(jnp.bfloat16)
    m2 = _banded_weight(w2, W, total_pix, offset=l_pix - 9,
                        dil=3).astype(jnp.bfloat16)

    b1_row = jnp.tile(b1, W).reshape(1, W * C_out).astype(jnp.float32)
    b2_row = jnp.tile(b2, W).reshape(1, W * C_out).astype(jnp.float32)
    a1 = p["a1"].reshape(1).astype(jnp.float32)
    a2 = p["a2"].reshape(1).astype(jnp.float32)

    kern = functools.partial(_lka_kernel, l_off=l_off)

    out = pl.pallas_call(
        kern,
        out_shape=jax.ShapeDtypeStruct((N, H, W * C_out), jnp.float32),
        grid_spec=pltpu.PrefetchScalarGridSpec(
            num_scalar_prefetch=0,
            grid=(N,),
            in_specs=[
                pl.BlockSpec((1, H + 4, (W + 4) * C_in), lambda b: (b, 0, 0)),
                pl.BlockSpec((5, (W + 4) * C_in, W * C_out),
                             lambda b: (0, 0, 0)),
                pl.BlockSpec((1, W * C_out), lambda b: (0, 0)),
                pl.BlockSpec(memory_space=pltpu.MemorySpace.SMEM),
                pl.BlockSpec((7, pw, W * C_out), lambda b: (0, 0, 0)),
                pl.BlockSpec((1, W * C_out), lambda b: (0, 0)),
                pl.BlockSpec(memory_space=pltpu.MemorySpace.SMEM),
            ],
            out_specs=pl.BlockSpec((1, H, W * C_out), lambda b: (b, 0, 0)),
            scratch_shapes=[pltpu.VMEM((H + 18, pw), jnp.float32)],
        ),
        compiler_params=pltpu.CompilerParams(
            dimension_semantics=("parallel",),          # batch is independent
            vmem_limit_bytes=48 * 1024 * 1024),
    )(x2d, m1, b1_row, a1, m2, b2_row, a2)

    # (N, H, W*Cout) -> NCHW
    out = out.reshape(N, H, W, C_out)
    return jnp.transpose(out, (0, 3, 1, 2))


def lka_reference(x_nchw, p):
    """Pure-JAX reference mirroring the PyTorch module (eval-mode BN)."""
    x = jnp.transpose(x_nchw, (0, 2, 3, 1))
    dn = ("NHWC", "HWIO", "NHWC")
    y = lax.conv_general_dilated(x, p["w1"], (1, 1), [(2, 2), (2, 2)],
                                 dimension_numbers=dn) + p["b1"]
    y = (y - p["m1"]) / jnp.sqrt(p["v1"] + EPS) * p["g1"] + p["be1"]
    y = jnp.where(y >= 0, y, p["a1"] * y)
    y = lax.conv_general_dilated(y, p["w2"], (1, 1), [(9, 9), (9, 9)],
                                 rhs_dilation=(3, 3),
                                 dimension_numbers=dn) + p["b2"]
    y = (y - p["m2"]) / jnp.sqrt(p["v2"] + EPS) * p["g2"] + p["be2"]
    y = jnp.where(y >= 0, y, p["a2"] * y)
    return jnp.transpose(y, (0, 3, 1, 2))


def make_params(key, c_in, c_out):
    ks = jax.random.split(key, 8)
    return {
        # conv1: 5x5, HWIO
        "w1": 0.1 * jax.random.normal(ks[0], (5, 5, c_in, c_out), jnp.float32),
        "b1": 0.1 * jax.random.normal(ks[1], (c_out,), jnp.float32),
        # BN1 (eval-mode running stats)
        "g1": 1.0 + 0.1 * jax.random.normal(ks[2], (c_out,), jnp.float32),
        "be1": 0.1 * jax.random.normal(ks[3], (c_out,), jnp.float32),
        "m1": jnp.zeros((c_out,), jnp.float32),
        "v1": jnp.ones((c_out,), jnp.float32),
        # PReLU() default: single parameter, init 0.25
        "a1": jnp.array(0.25, jnp.float32),
        # conv2: 7x7, dilation 3, HWIO
        "w2": 0.1 * jax.random.normal(ks[4], (7, 7, c_out, c_out), jnp.float32),
        "b2": 0.1 * jax.random.normal(ks[5], (c_out,), jnp.float32),
        # BN2
        "g2": 1.0 + 0.1 * jax.random.normal(ks[6], (c_out,), jnp.float32),
        "be2": 0.1 * jax.random.normal(ks[7], (c_out,), jnp.float32),
        "m2": jnp.zeros((c_out,), jnp.float32),
        "v2": jnp.ones((c_out,), jnp.float32),
        "a2": jnp.array(0.25, jnp.float32),
    }


if __name__ == "__main__":
    key = jax.random.PRNGKey(0)
    kx, kp = jax.random.split(key)

    N, C_IN, C_OUT, H, W = 2, 4, 8, 16, 16
    x = jax.random.normal(kx, (N, C_IN, H, W), jnp.float32)
    params = make_params(kp, C_IN, C_OUT)

    out = jax.block_until_ready(lka_forward(x, params))
    ref = jax.block_until_ready(lka_reference(x, params))

    assert out.shape == (N, C_OUT, H, W), out.shape
    # bf16 MXU operands (f32 accumulation) vs. the f32 reference.
    assert bool(jnp.allclose(out, ref, rtol=2e-2, atol=3e-2)), (
        "max abs diff:", float(jnp.max(jnp.abs(out - ref))))
    print("KERNEL_OK")
</pallas_src>

<mosaic_0001>
module attributes {stable_mosaic.version = 11 : i64} {
  func.func @_lka_kernel(%arg0: i32, %arg1: memref<1x20x80xf32, #tpu.memory_space<vmem>>, %arg2: memref<5x80x128xbf16, #tpu.memory_space<vmem>>, %arg3: memref<1x128xf32, #tpu.memory_space<vmem>>, %arg4: memref<1xf32, #tpu.memory_space<smem>>, %arg5: memref<7x384x128xbf16, #tpu.memory_space<vmem>>, %arg6: memref<1x128xf32, #tpu.memory_space<vmem>>, %arg7: memref<1xf32, #tpu.memory_space<smem>>, %arg8: memref<1x16x128xf32, #tpu.memory_space<vmem>>, %arg9: memref<34x384xf32, #tpu.memory_space<vmem>>) attributes {dimension_semantics = [#tpu.dimension_semantics<parallel>], iteration_bounds = array<i64: 2>, scalar_prefetch = 0 : i64, scratch_operands = 1 : i64, tpu.core_type = #tpu.core_type<tc>, window_params = [{transform_indices = @transform_0, window_bounds = array<i64: 1, 20, 80>}, {pipeline_mode = #tpu.pipeline_mode<synchronous>, transform_indices = @transform_1, window_bounds = array<i64: 5, 80, 128>}, {pipeline_mode = #tpu.pipeline_mode<synchronous>, transform_indices = @transform_2, window_bounds = array<i64: 1, 128>}, {transform_indices = @transform_3, window_bounds = array<i64: 1>}, {pipeline_mode = #tpu.pipeline_mode<synchronous>, transform_indices = @transform_4, window_bounds = array<i64: 7, 384, 128>}, {pipeline_mode = #tpu.pipeline_mode<synchronous>, transform_indices = @transform_5, window_bounds = array<i64: 1, 128>}, {transform_indices = @transform_6, window_bounds = array<i64: 1>}, {transform_indices = @transform_7, window_bounds = array<i64: 1, 16, 128>}]} {
    %cst = arith.constant 0.000000e+00 : f32
    %0 = vector.broadcast %cst : f32 to vector<16x128xf32>
    %c0 = arith.constant 0 : index
    %c0_0 = arith.constant 0 : index
    %c0_1 = arith.constant 0 : index
    %1 = vector.load %arg1[%c0, %c0_0, %c0_1] : memref<1x20x80xf32, #tpu.memory_space<vmem>>, vector<1x16x80xf32>
    %2 = vector.shape_cast %1 : vector<1x16x80xf32> to vector<16x80xf32>
    %3 = arith.truncf %2 : vector<16x80xf32> to vector<16x80xbf16>
    %c0_2 = arith.constant 0 : index
    %c0_3 = arith.constant 0 : index
    %c0_4 = arith.constant 0 : index
    %4 = vector.load %arg2[%c0_2, %c0_3, %c0_4] : memref<5x80x128xbf16, #tpu.memory_space<vmem>>, vector<1x80x128xbf16>
    %5 = vector.shape_cast %4 : vector<1x80x128xbf16> to vector<80x128xbf16>
    %cst_5 = arith.constant dense<0.000000e+00> : vector<16x128xf32>
    %6 = tpu.matmul %3, %5, %cst_5 {dimension_numbers = #tpu.dot_dimension_numbers<[1], [0], [0], [1], [0, 0, 1, 1], [], []>} : vector<16x80xbf16>, vector<80x128xbf16>, vector<16x128xf32> -> vector<16x128xf32>
    %7 = arith.addf %0, %6 : vector<16x128xf32>
    %c0_6 = arith.constant 0 : index
    %c1 = arith.constant 1 : index
    %c0_7 = arith.constant 0 : index
    %8 = vector.load %arg1[%c0_6, %c1, %c0_7] : memref<1x20x80xf32, #tpu.memory_space<vmem>>, vector<1x16x80xf32>
    %9 = vector.shape_cast %8 : vector<1x16x80xf32> to vector<16x80xf32>
    %10 = arith.truncf %9 : vector<16x80xf32> to vector<16x80xbf16>
    %c1_8 = arith.constant 1 : index
    %c0_9 = arith.constant 0 : index
    %c0_10 = arith.constant 0 : index
    %11 = vector.load %arg2[%c1_8, %c0_9, %c0_10] : memref<5x80x128xbf16, #tpu.memory_space<vmem>>, vector<1x80x128xbf16>
    %12 = vector.shape_cast %11 : vector<1x80x128xbf16> to vector<80x128xbf16>
    %cst_11 = arith.constant dense<0.000000e+00> : vector<16x128xf32>
    %13 = tpu.matmul %10, %12, %cst_11 {dimension_numbers = #tpu.dot_dimension_numbers<[1], [0], [0], [1], [0, 0, 1, 1], [], []>} : vector<16x80xbf16>, vector<80x128xbf16>, vector<16x128xf32> -> vector<16x128xf32>
    %14 = arith.addf %7, %13 : vector<16x128xf32>
    %c0_12 = arith.constant 0 : index
    %c2 = arith.constant 2 : index
    %c0_13 = arith.constant 0 : index
    %15 = vector.load %arg1[%c0_12, %c2, %c0_13] : memref<1x20x80xf32, #tpu.memory_space<vmem>>, vector<1x16x80xf32>
    %16 = vector.shape_cast %15 : vector<1x16x80xf32> to vector<16x80xf32>
    %17 = arith.truncf %16 : vector<16x80xf32> to vector<16x80xbf16>
    %c2_14 = arith.constant 2 : index
    %c0_15 = arith.constant 0 : index
    %c0_16 = arith.constant 0 : index
    %18 = vector.load %arg2[%c2_14, %c0_15, %c0_16] : memref<5x80x128xbf16, #tpu.memory_space<vmem>>, vector<1x80x128xbf16>
    %19 = vector.shape_cast %18 : vector<1x80x128xbf16> to vector<80x128xbf16>
    %cst_17 = arith.constant dense<0.000000e+00> : vector<16x128xf32>
    %20 = tpu.matmul %17, %19, %cst_17 {dimension_numbers = #tpu.dot_dimension_numbers<[1], [0], [0], [1], [0, 0, 1, 1], [], []>} : vector<16x80xbf16>, vector<80x128xbf16>, vector<16x128xf32> -> vector<16x128xf32>
    %21 = arith.addf %14, %20 : vector<16x128xf32>
    %c0_18 = arith.constant 0 : index
    %c3 = arith.constant 3 : index
    %c0_19 = arith.constant 0 : index
    %22 = vector.load %arg1[%c0_18, %c3, %c0_19] : memref<1x20x80xf32, #tpu.memory_space<vmem>>, vector<1x16x80xf32>
    %23 = vector.shape_cast %22 : vector<1x16x80xf32> to vector<16x80xf32>
    %24 = arith.truncf %23 : vector<16x80xf32> to vector<16x80xbf16>
    %c3_20 = arith.constant 3 : index
    %c0_21 = arith.constant 0 : index
    %c0_22 = arith.constant 0 : index
    %25 = vector.load %arg2[%c3_20, %c0_21, %c0_22] : memref<5x80x128xbf16, #tpu.memory_space<vmem>>, vector<1x80x128xbf16>
    %26 = vector.shape_cast %25 : vector<1x80x128xbf16> to vector<80x128xbf16>
    %cst_23 = arith.constant dense<0.000000e+00> : vector<16x128xf32>
    %27 = tpu.matmul %24, %26, %cst_23 {dimension_numbers = #tpu.dot_dimension_numbers<[1], [0], [0], [1], [0, 0, 1, 1], [], []>} : vector<16x80xbf16>, vector<80x128xbf16>, vector<16x128xf32> -> vector<16x128xf32>
    %28 = arith.addf %21, %27 : vector<16x128xf32>
    %c0_24 = arith.constant 0 : index
    %c4 = arith.constant 4 : index
    %c0_25 = arith.constant 0 : index
    %29 = vector.load %arg1[%c0_24, %c4, %c0_25] : memref<1x20x80xf32, #tpu.memory_space<vmem>>, vector<1x16x80xf32>
    %30 = vector.shape_cast %29 : vector<1x16x80xf32> to vector<16x80xf32>
    %31 = arith.truncf %30 : vector<16x80xf32> to vector<16x80xbf16>
    %c4_26 = arith.constant 4 : index
    %c0_27 = arith.constant 0 : index
    %c0_28 = arith.constant 0 : index
    %32 = vector.load %arg2[%c4_26, %c0_27, %c0_28] : memref<5x80x128xbf16, #tpu.memory_space<vmem>>, vector<1x80x128xbf16>
    %33 = vector.shape_cast %32 : vector<1x80x128xbf16> to vector<80x128xbf16>
    %cst_29 = arith.constant dense<0.000000e+00> : vector<16x128xf32>
    %34 = tpu.matmul %31, %33, %cst_29 {dimension_numbers = #tpu.dot_dimension_numbers<[1], [0], [0], [1], [0, 0, 1, 1], [], []>} : vector<16x80xbf16>, vector<80x128xbf16>, vector<16x128xf32> -> vector<16x128xf32>
    %35 = arith.addf %28, %34 : vector<16x128xf32>
    %c0_30 = arith.constant 0 : index
    %c0_31 = arith.constant 0 : index
    %36 = vector.load %arg3[%c0_30, %c0_31] : memref<1x128xf32, #tpu.memory_space<vmem>>, vector<1x128xf32>
    %37 = vector.broadcast %36 : vector<1x128xf32> to vector<16x128xf32>
    %38 = arith.addf %35, %37 : vector<16x128xf32>
    %c0_32 = arith.constant 0 : index
    %39 = memref.load %arg4[%c0_32] : memref<1xf32, #tpu.memory_space<smem>>
    %cst_33 = arith.constant 0.000000e+00 : f32
    %40 = vector.broadcast %cst_33 : f32 to vector<16x128xf32>
    %41 = arith.cmpf oge, %38, %40 : vector<16x128xf32>
    %42 = vector.broadcast %39 : f32 to vector<16x128xf32>
    %43 = arith.mulf %42, %38 : vector<16x128xf32>
    %44 = arith.select %41, %38, %43 : vector<16x128xi1>, vector<16x128xf32>
    %cst_34 = arith.constant 0.000000e+00 : f32
    %45 = vector.broadcast %cst_34 : f32 to vector<9x384xf32>
    %c0_35 = arith.constant 0 : index
    %c0_36 = arith.constant 0 : index
    %46 = vector.load %arg9[%c0_35, %c0_36] : memref<34x384xf32, #tpu.memory_space<vmem>>, vector<9x384xf32>
    tpu.vector_store %arg9[%c0_35, %c0_36], %45 {strides = array<i32>} : memref<34x384xf32, #tpu.memory_space<vmem>>, vector<9x384xf32>,
    %c25 = arith.constant 25 : index
    %c0_37 = arith.constant 0 : index
    %47 = vector.load %arg9[%c25, %c0_37] : memref<34x384xf32, #tpu.memory_space<vmem>>, vector<9x384xf32>
    tpu.vector_store %arg9[%c25, %c0_37], %45 {strides = array<i32>} : memref<34x384xf32, #tpu.memory_space<vmem>>, vector<9x384xf32>,
    %cst_38 = arith.constant 0.000000e+00 : f32
    %48 = vector.broadcast %cst_38 : f32 to vector<16x128xf32>
    %c9 = arith.constant 9 : index
    %c0_39 = arith.constant 0 : index
    %49 = vector.load %arg9[%c9, %c0_39] : memref<34x384xf32, #tpu.memory_space<vmem>>, vector<16x128xf32>
    tpu.vector_store %arg9[%c9, %c0_39], %48 {strides = array<i32>} : memref<34x384xf32, #tpu.memory_space<vmem>>, vector<16x128xf32>,
    %cst_40 = arith.constant 0.000000e+00 : f32
    %50 = vector.broadcast %cst_40 : f32 to vector<16x128xf32>
    %c9_41 = arith.constant 9 : index
    %c256 = arith.constant 256 : index
    %51 = vector.load %arg9[%c9_41, %c256] : memref<34x384xf32, #tpu.memory_space<vmem>>, vector<16x128xf32>
    tpu.vector_store %arg9[%c9_41, %c256], %50 {strides = array<i32>} : memref<34x384xf32, #tpu.memory_space<vmem>>, vector<16x128xf32>,
    %c9_42 = arith.constant 9 : index
    %c128 = arith.constant 128 : index
    %52 = vector.load %arg9[%c9_42, %c128] : memref<34x384xf32, #tpu.memory_space<vmem>>, vector<16x128xf32>
    tpu.vector_store %arg9[%c9_42, %c128], %44 {strides = array<i32>} : memref<34x384xf32, #tpu.memory_space<vmem>>, vector<16x128xf32>,
    %cst_43 = arith.constant 0.000000e+00 : f32
    %53 = vector.broadcast %cst_43 : f32 to vector<16x128xf32>
    %c0_44 = arith.constant 0 : index
    %c0_45 = arith.constant 0 : index
    %54 = vector.load %arg9[%c0_44, %c0_45] : memref<34x384xf32, #tpu.memory_space<vmem>>, vector<16x384xf32>
    %55 = arith.truncf %54 : vector<16x384xf32> to vector<16x384xbf16>
    %c0_46 = arith.constant 0 : index
    %c0_47 = arith.constant 0 : index
    %c0_48 = arith.constant 0 : index
    %56 = vector.load %arg5[%c0_46, %c0_47, %c0_48] : memref<7x384x128xbf16, #tpu.memory_space<vmem>>, vector<1x384x128xbf16>
    %57 = vector.shape_cast %56 : vector<1x384x128xbf16> to vector<384x128xbf16>
    %cst_49 = arith.constant dense<0.000000e+00> : vector<16x128xf32>
    %58 = tpu.matmul %55, %57, %cst_49 {dimension_numbers = #tpu.dot_dimension_numbers<[1], [0], [0], [1], [0, 0, 1, 1], [], []>} : vector<16x384xbf16>, vector<384x128xbf16>, vector<16x128xf32> -> vector<16x128xf32>
    %59 = arith.addf %53, %58 : vector<16x128xf32>
    %c3_50 = arith.constant 3 : index
    %c0_51 = arith.constant 0 : index
    %60 = vector.load %arg9[%c3_50, %c0_51] : memref<34x384xf32, #tpu.memory_space<vmem>>, vector<16x384xf32>
    %61 = arith.truncf %60 : vector<16x384xf32> to vector<16x384xbf16>
    %c1_52 = arith.constant 1 : index
    %c0_53 = arith.constant 0 : index
    %c0_54 = arith.constant 0 : index
    %62 = vector.load %arg5[%c1_52, %c0_53, %c0_54] : memref<7x384x128xbf16, #tpu.memory_space<vmem>>, vector<1x384x128xbf16>
    %63 = vector.shape_cast %62 : vector<1x384x128xbf16> to vector<384x128xbf16>
    %cst_55 = arith.constant dense<0.000000e+00> : vector<16x128xf32>
    %64 = tpu.matmul %61, %63, %cst_55 {dimension_numbers = #tpu.dot_dimension_numbers<[1], [0], [0], [1], [0, 0, 1, 1], [], []>} : vector<16x384xbf16>, vector<384x128xbf16>, vector<16x128xf32> -> vector<16x128xf32>
    %65 = arith.addf %59, %64 : vector<16x128xf32>
    %c6 = arith.constant 6 : index
    %c0_56 = arith.constant 0 : index
    %66 = vector.load %arg9[%c6, %c0_56] : memref<34x384xf32, #tpu.memory_space<vmem>>, vector<16x384xf32>
    %67 = arith.truncf %66 : vector<16x384xf32> to vector<16x384xbf16>
    %c2_57 = arith.constant 2 : index
    %c0_58 = arith.constant 0 : index
    %c0_59 = arith.constant 0 : index
    %68 = vector.load %arg5[%c2_57, %c0_58, %c0_59] : memref<7x384x128xbf16, #tpu.memory_space<vmem>>, vector<1x384x128xbf16>
    %69 = vector.shape_cast %68 : vector<1x384x128xbf16> to vector<384x128xbf16>
    %cst_60 = arith.constant dense<0.000000e+00> : vector<16x128xf32>
    %70 = tpu.matmul %67, %69, %cst_60 {dimension_numbers = #tpu.dot_dimension_numbers<[1], [0], [0], [1], [0, 0, 1, 1], [], []>} : vector<16x384xbf16>, vector<384x128xbf16>, vector<16x128xf32> -> vector<16x128xf32>
    %71 = arith.addf %65, %70 : vector<16x128xf32>
    %c9_61 = arith.constant 9 : index
    %c0_62 = arith.constant 0 : index
    %72 = vector.load %arg9[%c9_61, %c0_62] : memref<34x384xf32, #tpu.memory_space<vmem>>, vector<16x384xf32>
    %73 = arith.truncf %72 : vector<16x384xf32> to vector<16x384xbf16>
    %c3_63 = arith.constant 3 : index
    %c0_64 = arith.constant 0 : index
    %c0_65 = arith.constant 0 : index
    %74 = vector.load %arg5[%c3_63, %c0_64, %c0_65] : memref<7x384x128xbf16, #tpu.memory_space<vmem>>, vector<1x384x128xbf16>
    %75 = vector.shape_cast %74 : vector<1x384x128xbf16> to vector<384x128xbf16>
    %cst_66 = arith.constant dense<0.000000e+00> : vector<16x128xf32>
    %76 = tpu.matmul %73, %75, %cst_66 {dimension_numbers = #tpu.dot_dimension_numbers<[1], [0], [0], [1], [0, 0, 1, 1], [], []>} : vector<16x384xbf16>, vector<384x128xbf16>, vector<16x128xf32> -> vector<16x128xf32>
    %77 = arith.addf %71, %76 : vector<16x128xf32>
    %c12 = arith.constant 12 : index
    %c0_67 = arith.constant 0 : index
    %78 = vector.load %arg9[%c12, %c0_67] : memref<34x384xf32, #tpu.memory_space<vmem>>, vector<16x384xf32>
    %79 = arith.truncf %78 : vector<16x384xf32> to vector<16x384xbf16>
    %c4_68 = arith.constant 4 : index
    %c0_69 = arith.constant 0 : index
    %c0_70 = arith.constant 0 : index
    %80 = vector.load %arg5[%c4_68, %c0_69, %c0_70] : memref<7x384x128xbf16, #tpu.memory_space<vmem>>, vector<1x384x128xbf16>
    %81 = vector.shape_cast %80 : vector<1x384x128xbf16> to vector<384x128xbf16>
    %cst_71 = arith.constant dense<0.000000e+00> : vector<16x128xf32>
    %82 = tpu.matmul %79, %81, %cst_71 {dimension_numbers = #tpu.dot_dimension_numbers<[1], [0], [0], [1], [0, 0, 1, 1], [], []>} : vector<16x384xbf16>, vector<384x128xbf16>, vector<16x128xf32> -> vector<16x128xf32>
    %83 = arith.addf %77, %82 : vector<16x128xf32>
    %c15 = arith.constant 15 : index
    %c0_72 = arith.constant 0 : index
    %84 = vector.load %arg9[%c15, %c0_72] : memref<34x384xf32, #tpu.memory_space<vmem>>, vector<16x384xf32>
    %85 = arith.truncf %84 : vector<16x384xf32> to vector<16x384xbf16>
    %c5 = arith.constant 5 : index
    %c0_73 = arith.constant 0 : index
    %c0_74 = arith.constant 0 : index
    %86 = vector.load %arg5[%c5, %c0_73, %c0_74] : memref<7x384x128xbf16, #tpu.memory_space<vmem>>, vector<1x384x128xbf16>
    %87 = vector.shape_cast %86 : vector<1x384x128xbf16> to vector<384x128xbf16>
    %cst_75 = arith.constant dense<0.000000e+00> : vector<16x128xf32>
    %88 = tpu.matmul %85, %87, %cst_75 {dimension_numbers = #tpu.dot_dimension_numbers<[1], [0], [0], [1], [0, 0, 1, 1], [], []>} : vector<16x384xbf16>, vector<384x128xbf16>, vector<16x128xf32> -> vector<16x128xf32>
    %89 = arith.addf %83, %88 : vector<16x128xf32>
    %c18 = arith.constant 18 : index
    %c0_76 = arith.constant 0 : index
    %90 = vector.load %arg9[%c18, %c0_76] : memref<34x384xf32, #tpu.memory_space<vmem>>, vector<16x384xf32>
    %91 = arith.truncf %90 : vector<16x384xf32> to vector<16x384xbf16>
    %c6_77 = arith.constant 6 : index
    %c0_78 = arith.constant 0 : index
    %c0_79 = arith.constant 0 : index
    %92 = vector.load %arg5[%c6_77, %c0_78, %c0_79] : memref<7x384x128xbf16, #tpu.memory_space<vmem>>, vector<1x384x128xbf16>
    %93 = vector.shape_cast %92 : vector<1x384x128xbf16> to vector<384x128xbf16>
    %cst_80 = arith.constant dense<0.000000e+00> : vector<16x128xf32>
    %94 = tpu.matmul %91, %93, %cst_80 {dimension_numbers = #tpu.dot_dimension_numbers<[1], [0], [0], [1], [0, 0, 1, 1], [], []>} : vector<16x384xbf16>, vector<384x128xbf16>, vector<16x128xf32> -> vector<16x128xf32>
    %95 = arith.addf %89, %94 : vector<16x128xf32>
    %c0_81 = arith.constant 0 : index
    %c0_82 = arith.constant 0 : index
    %96 = vector.load %arg6[%c0_81, %c0_82] : memref<1x128xf32, #tpu.memory_space<vmem>>, vector<1x128xf32>
    %97 = vector.broadcast %96 : vector<1x128xf32> to vector<16x128xf32>
    %98 = arith.addf %95, %97 : vector<16x128xf32>
    %c0_83 = arith.constant 0 : index
    %99 = memref.load %arg7[%c0_83] : memref<1xf32, #tpu.memory_space<smem>>
    %cst_84 = arith.constant 0.000000e+00 : f32
    %100 = vector.broadcast %cst_84 : f32 to vector<16x128xf32>
    %101 = arith.cmpf oge, %98, %100 : vector<16x128xf32>
    %102 = vector.broadcast %99 : f32 to vector<16x128xf32>
    %103 = arith.mulf %102, %98 : vector<16x128xf32>
    %104 = arith.select %101, %98, %103 : vector<16x128xi1>, vector<16x128xf32>
    %c0_85 = arith.constant 0 : index
    %c0_86 = arith.constant 0 : index
    %c0_87 = arith.constant 0 : index
    %105 = vector.load %arg8[%c0_85, %c0_86, %c0_87] : memref<1x16x128xf32, #tpu.memory_space<vmem>>, vector<1x16x128xf32>
    %106 = vector.shape_cast %105 : vector<1x16x128xf32> to vector<16x128xf32>
    %107 = vector.shape_cast %104 : vector<16x128xf32> to vector<1x16x128xf32>
    tpu.vector_store %arg8[%c0_85, %c0_86, %c0_87], %107 {strides = array<i32>} : memref<1x16x128xf32, #tpu.memory_space<vmem>>, vector<1x16x128xf32>,
    return
  }
  func.func @transform_0(%arg0: i32) -> (i32, i32, i32) {
    %c0_i32 = arith.constant 0 : i32
    %c0_i32_0 = arith.constant 0 : i32
    %c0_i32_1 = arith.constant 0 : i32
    return %arg0, %c0_i32, %c0_i32_0 : i32, i32, i32
  }
  func.func @transform_1(%arg0: i32) -> (i32, i32, i32) {
    %c0_i32 = arith.constant 0 : i32
    %c0_i32_0 = arith.constant 0 : i32
    %c0_i32_1 = arith.constant 0 : i32
    %c0_i32_2 = arith.constant 0 : i32
    return %c0_i32, %c0_i32_0, %c0_i32_1 : i32, i32, i32
  }
  func.func @transform_2(%arg0: i32) -> (i32, i32) {
    %c0_i32 = arith.constant 0 : i32
    %c0_i32_0 = arith.constant 0 : i32
    %c0_i32_1 = arith.constant 0 : i32
    return %c0_i32, %c0_i32_0 : i32, i32
  }
  func.func @transform_3(%arg0: i32) -> i32 {
    %c0_i32 = arith.constant 0 : i32
    %c0_i32_0 = arith.constant 0 : i32
    return %c0_i32 : i32
  }
  func.func @transform_4(%arg0: i32) -> (i32, i32, i32) {
    %c0_i32 = arith.constant 0 : i32
    %c0_i32_0 = arith.constant 0 : i32
    %c0_i32_1 = arith.constant 0 : i32
    %c0_i32_2 = arith.constant 0 : i32
    return %c0_i32, %c0_i32_0, %c0_i32_1 : i32, i32, i32
  }
  func.func @transform_5(%arg0: i32) -> (i32, i32) {
    %c0_i32 = arith.constant 0 : i32
    %c0_i32_0 = arith.constant 0 : i32
    %c0_i32_1 = arith.constant 0 : i32
    return %c0_i32, %c0_i32_0 : i32, i32
  }
  func.func @transform_6(%arg0: i32) -> i32 {
    %c0_i32 = arith.constant 0 : i32
    %c0_i32_0 = arith.constant 0 : i32
    return %c0_i32 : i32
  }
  func.func @transform_7(%arg0: i32) -> (i32, i32, i32) {
    %c0_i32 = arith.constant 0 : i32
    %c0_i32_0 = arith.constant 0 : i32
    %c0_i32_1 = arith.constant 0 : i32
    return %arg0, %c0_i32, %c0_i32_0 : i32, i32, i32
  }
}

</mosaic_0001>

<bundles_post_ra>
// kernel: tpu_custom_call.1
= control target key start
LH: loop header
LB: loop body
LE: loop exit
PB: predicated region body
PF: predicated region fallthrough
CT: control target
= control target key end

     0   :  { %s4642_s0 = inlined_call_operand.vmem [shape: f32[2,20,80], index: 0, kind: input, shape index: {}]   ;;  %s4643_s1 = inlined_call_operand.hbm [shape: bf16[5,80,128], index: 1, kind: input, shape index: {}]   ;;  %s4644_s2 = inlined_call_operand.vmem [shape: f32[1,128], index: 2, kind: input, shape index: {}]   ;;  %s4645_s3 = inlined_call_operand.<no memory space> [shape: f32[1], index: 3, kind: input, shape index: {}]   ;;  %s4646_s4 = inlined_call_operand.hbm [shape: bf16[7,384,128], index: 4, kind: input, shape index: {}]   ;;  %s4647_s5 = inlined_call_operand.vmem [shape: f32[1,128], index: 5, kind: input, shape index: {}]   ;;  %s4648_s6 = inlined_call_operand.<no memory space> [shape: f32[1], index: 6, kind: input, shape index: {}]   ;;  %s4649_s7 = inlined_call_operand.hbm [shape: f32[2,16,128], index: 7, kind: output, shape index: {}]  }
   0x1   :  { %12 = sst [smem:[#allocation3]] %s4645_s3 }
   0x2   :  { %13 = sst [smem:[#allocation4]] %s4648_s6 }
   0x3   :  { %14 = vsyncpa [#allocation6], 0 }
   0x4   :  { %15 = vsyncpa [#allocation9], 0 }
   0x5   :  { %16 = vsyncpa [#allocation7], 0 }
   0x6   :  { %18 = vsyncpa [#allocation7 + $0x1], 0  ;;  %s4260_s28 = smov 0   ;;  %s4262_s29 = smov 0  }
   0x7   :  { %s4264_s30 = smov 0   ;;  %s4266_s8 = smov 0  }
   0x8 LB: > { %s4281_s3 = sadd.s32 4294967295, %s4203_s8   ;;  %s3148_s6 = sadd.s32 4294967294, %s4203_s8   ;;  %s4203_s8 = sphi %s4266_s8, %s4663_s8   ;;  %s4199_s30 = sphi %s4264_s30, %s4662_s30   ;;  %s4195_s29 = sphi %s4262_s29, %s4661_s29   ;;  %s4191_s28 = sphi %s4260_s28, %s4660_s28  }
   0x9   : > { %s4285_s9 = sadd.s32 1, %s4203_s8   ;;  %s183_s10 = sadd.s32 1, %s4199_s30 }
   0xa   : > { %s180_s11 = ssub.s32 %s4203_s8, %s4285_s9  ;;  %p193_p0 = scmp.ne.s32.totalorder %s4199_s30, %s4195_s29 }
   0xb   : > { %p181_p1 = scmp.eq.s32.totalorder %s180_s11, 0  ;;  %p194_p2 = scmp.eq.s32.totalorder %s4281_s3, 1 }
   0xc   : > { %p199_p3 = scmp.ne.s32.totalorder %s4195_s29, %s4191_s28  ;;  %p200_p4 = scmp.eq.s32.totalorder %s3148_s6, 1 }
   0xd   : > { %s4296_s12 = scalar_select %p181_p1, %s4199_s30, %s183_s10  }
   0xe   : > { %p4298_p5 = por %p194_p2, %p193_p0  ;;  %p4302_p6 = por %p200_p4, %p199_p3 }
   0xf   : > { %p3149_p7 = scmp.ge.s32.totalorder %s4203_s8, 1  ;;  %p207_p8 = scmp.lt.s32.totalorder %s4203_s8, 3 }
  0x10   : > { %s4652_s14 = scalar_select %p4302_p6, 1, 0 }
  0x11   : > { %p4650_p9 = scmp.eq.s32.totalorder %s4281_s3, 0  ;;  %p4309_p10 = pnand %p3149_p7, %p207_p8 }
  0x12   : > { %s4205_s16 = smov [#allocation5]   ;;  %s4206_s19 = smov [#allocation8]  }
  0x13   : > { %s219_s17 = sshll.u32 %s4205_s16, 4  ;;  %p3832_p11 = pneg %p4309_p10  ;;  %s220_s17 = int_to_ptr.vmem [resolvable:$true] %s219_s17 }
  0x14   : > { %s238_s20 = sshll.u32 %s4206_s19, 4  ;;  %s4094_s21 = scalar_lea.vmem %s220_s17, 3200  ;;  %s239_s20 = int_to_ptr.vmem [resolvable:$true] %s238_s20 }
  0x15   : > { %p4317_p12 = pnand %p4650_p9, %p3832_p11  ;;  %p4095_p0 = scmp.ne.s32.totalorder %s220_s17, %s4094_s21 }
  0x16   : > { %p4102_p3 = scmp.lt.s32.totalorder %s220_s17, %s220_s17  ;;  %p4103_p4 = scmp.lt.s32.totalorder %s4094_s21, %s4094_s21 }
  0x17   : > { %p4085_p13 = pneg %p4317_p12 }
  0x18   : > { %p4104_p7 = por %p4103_p4, %p4102_p3 }
  0x19   : > { %p4097_p1 = pnand %p4095_p0, %p4085_p13 }
  0x1b   : > { %p4098_p2 = pneg %p4097_p1 }
  0x1d   : > { %p4105_p8 = pnand %p4104_p7, %p4098_p2 }
  0x1f   : > { %4108 = shalt.err (!%p4105_p8)
}
  0x20   : > { %s4207_s22 = smov 64   ;;  %s4208_s23 = smov 4  }
  0x21   : > { %3835 = dma.hbm_to_vmem [thread:$0]  (!%p4317_p12), %s4643_s1, 3200, %s220_s17, [#allocation6], %s4207_s22, %s4207_s22, %s4208_s23  }
  0x22   : > { %s4120_s26 = scalar_lea.vmem %s239_s20, 21504  ;;  %p4128_p9 = scmp.lt.s32.totalorder %s239_s20, %s239_s20 }
  0x23   : > { %p4121_p11 = scmp.ne.s32.totalorder %s239_s20, %s4120_s26  ;;  %p4129_p6 = scmp.lt.s32.totalorder %s4120_s26, %s4120_s26 }
  0x25   : > { %p4123_p0 = pnand %p4121_p11, %p4085_p13  ;;  %p4130_p3 = por %p4129_p6, %p4128_p9 }
  0x27   : > { %p4124_p1 = pneg %p4123_p0 }
  0x29   : > { %p4131_p2 = pnand %p4130_p3, %p4124_p1 }
  0x2b   : > { %4134 = shalt.err (!%p4131_p2)
}
  0x2c   : > { %3838 = dma.hbm_to_vmem [thread:$0]  (!%p4317_p12), %s4646_s4, 21504, %s239_s20, [#allocation9], %s4207_s22, %s4207_s22, %s4208_s23  }
  0x2d   : > { %268 = sbr.rel (%p4309_p10) target bundleno = 757 (0x2f5), region = 48  ;;  %p4655_p4 = scmp.eq.s32.totalorder (!%p4309_p10), %s4281_s3, 0 }
  0x32   : > { %4178 = dma.done.wait (%p4655_p4), [#allocation6], 3200   ;;  %p4656_p13 = pmov %p4655_p4 }
  0x33   : > { %p4657_p7 = pmov %p4655_p4 }
  0x34   : > { %4180 = vsyncadd (%p4656_p13), [#allocation6], 4294964096 }
  0x35   : > { %4182 = dma.done.wait (%p4657_p7), [#allocation9], 21504   ;;  %p4658_p6 = pmov %p4655_p4 }
  0x36   : > { %v4209_v0 = vmov 0.0   ;;  %vm4210_vm0 = vmmov 0   ;;  %p304_p9 = scmp.lt.s32.totalorder %s4281_s3, 1  ;;  %v3888_v1 = vld [vmem:[#allocation5 + $0x48] sm:$0xff]   ;;  %v3889_v2 = vld [vmem:[#allocation5 + $0x20] sm:$0xff]   ;;  %v3891_v4 = vld [vmem:[#allocation5 + $0x18] sm:$0xff]  }
  0x37   : > { %4184 = vsyncadd (%p4658_p6), [#allocation9], 4294945792  ;;  %3611 = vmatprep.subr.bf16.mxu0 %v4209_v0  ;;  %773 = vst [vmem:[#allocation2 + $0x48] sm:$0xff] %v4209_v0  ;;  %3625 = vmatprep.subr.bf16.mxu1 %v4209_v0  ;;  %v3890_v3 = vld [vmem:[#allocation5 + $0x40] sm:$0xff]   ;;  %v3892_v5 = vld [vmem:[#allocation5 + $0x38] sm:$0xff]   ;;  %vm367_vm1 = vcmask 654336  }
  0x38   : > { %774 = vst [vmem:[#allocation2] sm:$0xff] %v4209_v0  ;;  %775 = vst [vmem:[#allocation2 + $0x70] sm:$0xff] %v4209_v0  ;;  %3621 = vmatprep.mubr.msk.bf16.mxu0 %vm4210_vm0, %v4209_v0  ;;  %3635 = vmatprep.mubr.msk.bf16.mxu1 %vm4210_vm0, %v4209_v0  ;;  %s305_s10 = scalar_select %p304_p9, %s4281_s3, 1  ;;  %v3893_v6 = vld [vmem:[#allocation5 + $0x10] sm:$0xff]   ;;  %v3895_v8 = vld [vmem:[#allocation5 + $0x8] sm:$0xff]   ;;  %vm1495_vm3 = vcmask 1044480  }
  0x39   : > { %776 = vst [vmem:[#allocation2 + $0x18] sm:$0x1] %v4209_v0  ;;  %777 = vst [vmem:[#allocation2 + $0x68] sm:$0x1] %v4209_v0  ;;  %3612 = vmatpush3.bf16.msra.mxu0 %v3888_v1  ;;  %3626 = vmatpush3.bf16.msra.mxu1 %v3889_v2  ;;  %v3894_v7 = vld [vmem:[#allocation5 + $0x30] sm:$0xff]   ;;  %v3896_v9 = vld [vmem:[#allocation5 + $0x28] sm:$0xff]  }
  0x3a   : > { %778 = vst [vmem:[#allocation2 + $0x40] sm:$0x1] %v4209_v0  ;;  %779 = vst [vmem:[#allocation2 + $0x8] sm:$0xfe] %v4209_v0  ;;  %3613 = vmatprep.subr.bf16.mxu0 %v4209_v0  ;;  %3627 = vmatprep.subr.bf16.mxu1 %v4209_v0  ;;  %s3821_s11 = smul.u32 24, %s305_s10  ;;  %v3897_v11 = vld [vmem:[#allocation5] sm:$0xff]  }
  0x3b   : > { %780 = vst [vmem:[#allocation2 + $0x60] sm:$0xfe] %v4209_v0  ;;  %781 = vst [vmem:[#allocation2 + $0x58] sm:$0xfe] %v4209_v0  ;;  %v3898_v17 = vld [vmem:[#allocation5 + $0x70] sm:$0xff]   ;;  %v3899_v18 = vld [vmem:[#allocation5 + $0x98] sm:$0xff]  }
  0x3c   : > { %782 = vst [vmem:[#allocation2 + $0x20] sm:$0x3] %v4209_v0  ;;  %783 = vst [vmem:[#allocation2 + $0x10] sm:$0x3] %v4209_v0  ;;  %s4382_s17 = scalar_lea.vmem %s4642_s0, %s3821_s11  ;;  %v3900_v19 = vld [vmem:[#allocation5 + $0x68] sm:$0xff]   ;;  %v3901_v20 = vld [vmem:[#allocation5 + $0x90] sm:$0xff]  }
  0x3d   : > { %784 = vst [vmem:[#allocation2 + $0x50] sm:$0x3] %v4209_v0  ;;  %785 = vst [vmem:[#allocation2 + $0x18] sm:$0xfe] %v4209_v0  ;;  %3614 = vmatpush3.bf16.msra.mxu0 %v3890_v3  ;;  %3628 = vmatpush3.bf16.msra.mxu1 %v3891_v4  ;;  %v323_v10 = vld [vmem:[%s4382_s17 + $0x1] sm:$0xff]  ;;  %v324_v12 = vld [vmem:[%s4382_s17 + $0x9] sm:$0xff] }
  0x3e   : > { %786 = vst [vmem:[#allocation2 + $0x30] sm:$0xff] %v4209_v0  ;;  %787 = vst [vmem:[#allocation2 + $0x8] sm:$0x1] %v4209_v0  ;;  %3615 = vmatprep.subr.bf16.mxu0 %v4209_v0  ;;  %3629 = vmatprep.subr.bf16.mxu1 %v4209_v0  ;;  %v310_v13 = vld [vmem:[%s4382_s17] sm:$0xff]  ;;  %v311_v14 = vld [vmem:[%s4382_s17 + $0x8] sm:$0xff]  ;;  %v325_v15 = vpack.c.bf16 %v324_v12, %v323_v10  ;;  %s4474_s18 = sld [smem:[#allocation3]] }
  0x3f   : > { %788 = vst [vmem:[#allocation2 + $0x40] sm:$0xfe] %v4209_v0  ;;  %789 = vst [vmem:[#allocation2 + $0x38] sm:$0xff] %v4209_v0  ;;  %v312_v16 = vpack.c.bf16 %v311_v14, %v310_v13  ;;  %v3902_v21 = vld [vmem:[#allocation5 + $0x60] sm:$0xff]   ;;  %v3903_v22 = vld [vmem:[#allocation5 + $0x88] sm:$0xff]   ;;  %vm793_vm7 = vcmask 1040384  }
  0x40   : > { %790 = vst [vmem:[#allocation2 + $0x58] sm:$0x1] %v4209_v0  ;;  %v3904_v23 = vld [vmem:[#allocation5 + $0x58] sm:$0xff]   ;;  %v3905_v24 = vld [vmem:[#allocation5 + $0x80] sm:$0xff]   ;;  %v3906_v25 = vld [vmem:[#allocation5 + $0x50] sm:$0xff]   ;;  %vm2135_vm8 = vcmask 1045504  }
  0x41   : > { %3616 = vmatpush3.bf16.msra.mxu0 %v3892_v5  ;;  %3630 = vmatpush3.bf16.msra.mxu1 %v3893_v6  ;;  %v486_v26 = vld [vmem:[%s4382_s17 + $0x2] sm:$0xff]  ;;  %v487_v27 = vld [vmem:[%s4382_s17 + $0xa] sm:$0xff]  ;;  %v3908_v31 = vld [vmem:[#allocation5 + $0xc0] sm:$0xff]   ;;  %vm921_vm2 = vsmask.f32 6400  ;;  %vm2790_vm10 = vcmask 1046528  }
  0x42   : > { %3617 = vmatprep.subr.bf16.mxu0 %v4209_v0  ;;  %3631 = vmatprep.subr.bf16.mxu1 %v4209_v0  ;;  %v3907_v28 = vld [vmem:[#allocation5 + $0x78] sm:$0xff]   ;;  %v576_v29 = vld [vmem:[%s4382_s17 + $0x3] sm:$0xff]  ;;  %v488_v32 = vpack.c.bf16 %v487_v27, %v486_v26  ;;  %v3912_v37 = vld [vmem:[#allocation5 + $0xa0] sm:$0xff]   ;;  %vm1800_vm4 = vsmask.f32 7424  ;;  %s4582_s21 = sld [smem:[#allocation4]] }
  0x43   : > { %v577_v30 = vld [vmem:[%s4382_s17 + $0xb] sm:$0xff]  ;;  %v3911_v36 = vld [vmem:[#allocation5 + $0xa8] sm:$0xff]   ;;  %v3913_v41 = vld [vmem:[#allocation8 + $0x178] sm:$0xff]   ;;  %vm2437_vm9 = vsmask.f32 4352  ;;  %s301_s22 = sand.u32 1, %s4195_s29  }
  0x44   : > { %v578_v33 = vpack.c.bf16 %v577_v30, %v576_v29  ;;  %v3909_v34 = vld [vmem:[#allocation5 + $0xb8] sm:$0xff]   ;;  %v3910_v35 = vld [vmem:[#allocation5 + $0xb0] sm:$0xff]   ;;  %v3914_v42 = vld [vmem:[#allocation8 + $0x138] sm:$0xff]   ;;  %s3156_s25 = sshll.u32 %s301_s22, 4  ;;  %s3363_s26 = sshll.u32 %s4281_s3, 8 }
  0x45   : > { %3618 = vmatpush3.bf16.msra.mxu0 %v3894_v7  ;;  %3632 = vmatpush3.bf16.msra.mxu1 %v3895_v8  ;;  %v666_v38 = vld [vmem:[%s4382_s17 + $0x4] sm:$0xff]  ;;  %v667_v39 = vld [vmem:[%s4382_s17 + $0xc] sm:$0xff]  ;;  %v3915_v43 = vld [vmem:[#allocation8 + $0xf8] sm:$0xff]   ;;  %s303_s27 = scalar_lea.vmem [#allocation10], %s3156_s25  ;;  %s4598_s15 = scalar_lea.hbm %s4649_s7, %s3363_s26 }
  0x46   : > { %3619 = vmatprep.subr.bf16.mxu0 %v4209_v0  ;;  %3633 = vmatprep.subr.bf16.mxu1 %v4209_v0  ;;  %v668_v40 = vpack.c.bf16 %v667_v39, %v666_v38  ;;  %v3916_v44 = vld [vmem:[#allocation8 + $0x170] sm:$0xff]   ;;  %v3919_v47 = vld [vmem:[#allocation8 + $0x168] sm:$0xff]   ;;  %v3922_v50 = vld [vmem:[#allocation8 + $0x160] sm:$0xff]   ;;  %s3064_s6 = sshll.u32 %s303_s27, 4  ;;  %s4602_s3 = scalar_lea.sflag [#allocation7], %s301_s22  ;;  %s4600_s6 = int_to_ptr.vmem [resolvable:$true] %s3064_s6 }
  0x47   : > { %v3917_v45 = vld [vmem:[#allocation8 + $0x130] sm:$0xff]   ;;  %v3920_v48 = vld [vmem:[#allocation8 + $0x128] sm:$0xff]   ;;  %v3923_v51 = vld [vmem:[#allocation8 + $0x120] sm:$0xff]   ;;  %s4135_s16 = scalar_lea.vmem %s4600_s6, 256  ;;  %s4211_s17 = smov [#allocation10]  }
  0x48   : > { %v3918_v46 = vld [vmem:[#allocation8 + $0xf0] sm:$0xff]   ;;  %v3921_v49 = vld [vmem:[#allocation8 + $0xe8] sm:$0xff]   ;;  %v3924_v52 = vld [vmem:[#allocation8 + $0xe0] sm:$0xff]   ;;  %p4136_p10 = scmp.ne.s32.totalorder %s4600_s6, %s4135_s16 }
  0x49   : > { %3620 = vmatpush3.bf16.msra.mxu0 %v3896_v9  ;;  %3634 = vmatpush3.bf16.msra.mxu1 %v3897_v11  ;;  %v4430_v53 = vld [vmem:[#allocation2 + $0x48] sm:$0xff]  ;;  %v3925_v54 = vld [vmem:[#allocation8 + $0x158] sm:$0xff]   ;;  %v3928_v57 = vld [vmem:[#allocation8 + $0x150] sm:$0xff]  }
  0x4a   : > { %3639 = vmatprep.subr.bf16.mxu0 %v4209_v0  ;;  %3653 = vmatprep.subr.bf16.mxu1 %v4209_v0  ;;  %v3926_v55 = vld [vmem:[#allocation8 + $0x118] sm:$0xff]   ;;  %v3929_v58 = vld [vmem:[#allocation8 + $0x110] sm:$0xff]   ;;  %v4434_v60 = vld [vmem:[#allocation2 + $0x40] sm:$0xff]  ;;  %p4137_p12 = pnand %p4136_p10, %p4298_p5 }
  0x4b   : > { %v3927_v56 = vld [vmem:[#allocation8 + $0xd8] sm:$0xff]   ;;  %v3930_v59 = vld [vmem:[#allocation8 + $0xd0] sm:$0xff]   ;;  %v3932_v61 = vld [vmem:[#allocation8 + $0x108] sm:$0xff]   ;;  %v811_v27 = vpack.c.bf16 %v4434_v60, %v4430_v53 }
  0x4c   : > { %3622 = vmatmul.mubr.msk.bf16.vlgmr.msra.gmra.mxu0 %vm367_vm1, %v325_v15  ;;  %3636 = vmatmul.mubr.msk.bf16.vlgmr.msra.gmra.mxu1 %vm367_vm1, %v312_v16  ;;  %v862_v62 = vld [vmem:[#allocation2 + $0x70] sm:$0xf8]  ;;  %v865_v63 = vld [vmem:[#allocation2 + $0x38] sm:$0x7]  ;;  %v3933_v1 = vld [vmem:[#allocation8 + $0xc8] sm:$0xff]   ;;  %p4138_p8 = pneg %p4137_p12 }
  0x4d   : > { %3640 = vmatpush3.bf16.msra.mxu0 %v3898_v17  ;;  %3654 = vmatpush3.bf16.msra.mxu1 %v3899_v18  ;;  %v868_v2 = vpack.c.bf16 %v4434_v60, %v862_v62  ;;  %v871_v3 = vpack.c.bf16 %v865_v63, %v865_v63  ;;  %v3935_v4 = vld [vmem:[#allocation8 + $0x100] sm:$0xff]   ;;  %v3937_v18 = vld [vmem:[#allocation8 + $0xb8] sm:$0xff]   ;;  %v3964_v29 = vld [vmem:[#allocation8 + $0x230] sm:$0xff]  }
  0x4e   : > { %3641 = vmatprep.subr.bf16.mxu0 %v4209_v0  ;;  %3655 = vmatprep.subr.bf16.mxu1 %v4209_v0  ;;  %v3934_v9 = vld [vmem:[#allocation8 + $0x140] sm:$0xff]   ;;  %v3967_v30 = vld [vmem:[#allocation8 + $0x228] sm:$0xff]   ;;  %v1430_v39 = vld [vmem:[#allocation2 + $0x70] sm:$0xc0] }
  0x4f   : > { %3649 = vmatprep.mubr.msk.bf16.mxu0 %vm4210_vm0, %v4209_v0  ;;  %3663 = vmatprep.mubr.msk.bf16.mxu1 %vm4210_vm0, %v4209_v0  ;;  %v957_v5 = vshrl.u32 %v868_v2, 16  ;;  %v960_v6 = vshll.u32 %v868_v2, 16  ;;  %v965_v7 = vshrl.u32 %v871_v3, 16  ;;  %v968_v8 = vshll.u32 %v871_v3, 16  ;;  %v3936_v14 = vld [vmem:[#allocation8 + $0xc0] sm:$0xff]   ;;  %v4003_v2 = vld [vmem:[#allocation8 + $0x2c8] sm:$0xff]  }
  0x50   : > { %v3958_v26 = vld [vmem:[#allocation8 + $0x80] sm:$0xff]  }
  0x51   : > { %3642 = vmatpush3.bf16.msra.mxu0 %v3900_v19  ;;  %3656 = vmatpush3.bf16.msra.mxu1 %v3901_v20  ;;  %v959_v10 = vrot.slane %v957_v5, 1  ;;  %v962_v11 = vrot.slane %v960_v6, 2  ;;  %v967_v12 = vrot.slane %v965_v7, 1  ;;  %v970_v13 = vrot.slane %v968_v8, 2  ;;  %v3938_v19 = vld [vmem:[#allocation8 + $0x78] sm:$0xff]   ;;  %v3940_v20 = vld [vmem:[#allocation8 + $0xb0] sm:$0xff]  }
  0x52   : > { %3643 = vmatprep.subr.bf16.mxu0 %v4209_v0  ;;  %3657 = vmatprep.subr.bf16.mxu1 %v4209_v0  ;;  %v3982_v38 = vld [vmem:[#allocation8 + $0x200] sm:$0xff]   ;;  %v1744_v5 = vld [vmem:[#allocation2 + $0x58] sm:$0x1] }
  0x53   : > { %v963_v15 = vor.u32 %v962_v11, %v959_v10  ;;  %v971_v16 = vor.u32 %v970_v13, %v967_v12  ;;  %v1738_v3 = vld [vmem:[#allocation2 + $0x40] sm:$0xfe]  ;;  %v1750_v7 = vpack.c.bf16 %v1744_v5, %v1744_v5 }
  0x55   : > { %3644 = vmatpush3.bf16.msra.mxu0 %v3902_v21  ;;  %3658 = vmatpush3.bf16.msra.mxu1 %v3903_v22  ;;  %v972_v17 = vsel %vm921_vm2, %v963_v15, %v971_v16  ;;  %v3943_v21 = vld [vmem:[#allocation8 + $0xa8] sm:$0xff]   ;;  %v3946_v22 = vld [vmem:[#allocation8 + $0xa0] sm:$0xff]   ;;  %v1833_v13 = vshll.u32 %v1750_v7, 16 }
  0x56   : > { %3645 = vmatprep.subr.bf16.mxu0 %v4209_v0  ;;  %3659 = vmatprep.subr.bf16.mxu1 %v4209_v0 }
  0x57   : > { %v1835_v16 = vrot.slane %v1833_v13, 1 }
  0x59   : > { %3646 = vmatpush3.bf16.msra.mxu0 %v3904_v23  ;;  %3660 = vmatpush3.bf16.msra.mxu1 %v3905_v24  ;;  %v3949_v23 = vld [vmem:[#allocation8 + $0x98] sm:$0xff]   ;;  %v3952_v24 = vld [vmem:[#allocation8 + $0x90] sm:$0xff]  }
  0x5a   : > { %3647 = vmatprep.subr.bf16.mxu0 %v4209_v0  ;;  %3661 = vmatprep.subr.bf16.mxu1 %v4209_v0 }
  0x5d   : > { %3648 = vmatpush3.bf16.msra.mxu0 %v3906_v25  ;;  %3662 = vmatpush3.bf16.msra.mxu1 %v3907_v28  ;;  %v3955_v25 = vld [vmem:[#allocation8 + $0x88] sm:$0xff]   ;;  %v3961_v28 = vld [vmem:[#allocation8 + $0x238] sm:$0xff]  }
  0x5e   : > { %3667 = vmatprep.subr.bf16.mxu0 %v4209_v0  ;;  %3394 = vmatprep.subr.bf16.mxu1 %v3914_v42  ;;  %v1436_v42 = vpack.c.bf16 %v4434_v60, %v1430_v39 }
  0x60   : > { %3650 = vmatmul.mubr.msk.bf16.vlgmr.msra.gmra.mxu0 %vm367_vm1, %v488_v32  ;;  %3664 = vmatmul.mubr.msk.bf16.vlgmr.msra.gmra.mxu1 %vm367_vm1, %v578_v33  ;;  %v3973_v32 = vld [vmem:[#allocation8 + $0x218] sm:$0xff]   ;;  %v3976_v33 = vld [vmem:[#allocation8 + $0x210] sm:$0xff]  }
  0x61   : > { %3668 = vmatpush3.bf16.msra.mxu0 %v3908_v31  ;;  %3677 = vmatprep.mubr.msk.bf16.mxu0 %vm4210_vm0, %v4209_v0  ;;  %v3970_v31 = vld [vmem:[#allocation8 + $0x220] sm:$0xff]  }
  0x62   : > { %3669 = vmatprep.subr.bf16.mxu0 %v4209_v0  ;;  %3395 = vmatpush3.bf16.msra.mxu1 %v3915_v43 }
  0x63   : > { %3396 = vmatprep.subr.bf16.mxu1 %v3917_v45 }
  0x65   : > { %3670 = vmatpush3.bf16.msra.mxu0 %v3909_v34  ;;  %v3979_v34 = vld [vmem:[#allocation8 + $0x208] sm:$0xff]  }
  0x66   : > { %3671 = vmatprep.subr.bf16.mxu0 %v4209_v0  ;;  %3397 = vmatpush3.bf16.msra.mxu1 %v3918_v46  ;;  %v1502_v46 = vrot.slane %v1436_v42, 3 }
  0x67   : > { %3398 = vmatprep.subr.bf16.mxu1 %v3920_v48 }
  0x69   : > { %3672 = vmatpush3.bf16.msra.mxu0 %v3910_v35 }
  0x6a   : > { %3673 = vmatprep.subr.bf16.mxu0 %v4209_v0  ;;  %3399 = vmatpush3.bf16.msra.mxu1 %v3921_v49  ;;  %v3985_v49 = vld [vmem:[#allocation8 + $0x2f8] sm:$0xff]  }
  0x6b   : > { %3400 = vmatprep.subr.bf16.mxu1 %v3923_v51 }
  0x6d   : > { %3674 = vmatpush3.bf16.msra.mxu0 %v3911_v36 }
  0x6e   : > { %3675 = vmatprep.subr.bf16.mxu0 %v4209_v0  ;;  %3401 = vmatpush3.bf16.msra.mxu1 %v3924_v52  ;;  %v3988_v52 = vld [vmem:[#allocation8 + $0x2f0] sm:$0xff]  }
  0x6f   : > { %3402 = vmatprep.subr.bf16.mxu1 %v3926_v55  ;;  %v3994_v55 = vld [vmem:[#allocation8 + $0x2e0] sm:$0xff]  }
  0x71   : > { %3676 = vmatpush3.bf16.msra.mxu0 %v3912_v37 }
  0x72   : > { %3681 = vmatprep.subr.bf16.mxu0 %v4209_v0  ;;  %3403 = vmatpush3.bf16.msra.mxu1 %v3927_v56 }
  0x73   : > { %3404 = vmatprep.subr.bf16.mxu1 %v3929_v58 }
  0x74   : > { %3678 = vmatmul.mubr.msk.bf16.vlgmr.msra.gmra.mxu0 %vm367_vm1, %v668_v40 }
  0x75   : > { %3697 = vmatprep.mubr.msk.bf16.mxu0 %vm4210_vm0, %v4209_v0  ;;  %3682 = vmatpush3.bf16.msra.mxu0 %v3913_v41  ;;  %v1433_v41 = vld [vmem:[#allocation2 + $0x38] sm:$0x3f] }
  0x76   : > { %3683 = vmatprep.subr.bf16.mxu0 %v4209_v0  ;;  %3405 = vmatpush3.bf16.msra.mxu1 %v3930_v59  ;;  %v3997_v59 = vld [vmem:[#allocation8 + $0x2d8] sm:$0xff]  }
  0x77   : > { %3406 = vmatprep.subr.bf16.mxu1 %v3932_v61 }
  0x79   : > { %3684 = vmatpush3.bf16.msra.mxu0 %v3916_v44  ;;  %v1439_v44 = vpack.c.bf16 %v1433_v41, %v1433_v41 }
  0x7a   : > { %3685 = vmatprep.subr.bf16.mxu0 %v4209_v0  ;;  %3407 = vmatpush3.bf16.msra.mxu1 %v3933_v1 }
  0x7b   : > { %3408 = vmatprep.subr.bf16.mxu1 %v3935_v4  ;;  %v1503_v48 = vrot.slane %v1439_v44, 3  ;;  %v1747_v4 = vpack.c.bf16 %v4430_v53, %v1738_v3 }
  0x7d   : > { %3686 = vmatpush3.bf16.msra.mxu0 %v3919_v47  ;;  %v1504_v51 = vsel %vm1495_vm3, %v1502_v46, %v1503_v48  ;;  %v1828_v8 = vshll.u32 %v1747_v4, 16  ;;  %v1826_v11 = vshrl.u32 %v1747_v4, 16 }
  0x7e   : > { %3687 = vmatprep.subr.bf16.mxu0 %v4209_v0  ;;  %v3931_v0 = vld [vmem:[#allocation8 + $0x148] sm:$0xff]   ;;  %3409 = vmatpush3.bf16.msra.mxu1 %v3936_v14 }
  0x7f   : > { %3425 = vmatprep.subr.bf16.mxu1 %v3938_v19  ;;  %v1830_v12 = vrot.slane %v1828_v8, 1 }
  0x81   : > { %3688 = vmatpush3.bf16.msra.mxu0 %v3922_v50  ;;  %v1831_v15 = vor.u32 %v1830_v12, %v1826_v11 }
  0x82   : > { %3689 = vmatprep.subr.bf16.mxu0 %v4430_v53 }
  0x85   : > { %3690 = vmatpush3.bf16.msra.mxu0 %v3925_v54  ;;  %v3991_v54 = vld [vmem:[#allocation8 + $0x2e8] sm:$0xff]  }
  0x86   : > { %3691 = vmatprep.subr.bf16.mxu0 %v4430_v53 }
  0x89   : > { %3692 = vmatpush3.bf16.msra.mxu0 %v3928_v57 }
  0x8a   : > { %3693 = vmatprep.subr.bf16.mxu0 %v4430_v53 }
  0x8d   : > { %3694 = vmatpush3.bf16.msra.mxu0 %v3931_v0  ;;  %v4000_v0 = vld [vmem:[#allocation8 + $0x2d0] sm:$0xff]  }
  0x8e   : > { %3695 = vmatprep.subr.bf16.mxu0 %v4430_v53 }
  0x91   : > { %3696 = vmatpush3.bf16.msra.mxu0 %v3934_v9  ;;  %v4006_v9 = vld [vmem:[#allocation8 + $0x2c0] sm:$0xff]  }
  0x92   : > { %3701 = vmatprep.subr.bf16.mxu0 %v4430_v53 }
  0x94   : > { %3698 = vmatmul.mubr.bf16.vlgmr.msra.gmra.mxu0 %v972_v17  ;;  %v4009_v17 = vld [vmem:[#allocation8 + $0x3b8] sm:$0xff]  }
  0x95   : > { %3702 = vmatpush3.bf16.msra.mxu0 %v3937_v18  ;;  %3717 = vmatprep.mubr.msk.bf16.mxu0 %vm4210_vm0, %v4430_v53 }
  0x96   : > { %3703 = vmatprep.subr.bf16.mxu0 %v4430_v53 }
  0x99   : > { %3704 = vmatpush3.bf16.msra.mxu0 %v3940_v20  ;;  %v1836_v20 = vsel %vm1800_vm4, %v1831_v15, %v1835_v16 }
  0x9a   : > { %3705 = vmatprep.subr.bf16.mxu0 %v4430_v53 }
  0x9d   : > { %3706 = vmatpush3.bf16.msra.mxu0 %v3943_v21 }
  0x9e   : > { %3707 = vmatprep.subr.bf16.mxu0 %v4430_v53 }
  0xa1   : > { %3708 = vmatpush3.bf16.msra.mxu0 %v3946_v22  ;;  %v3188_v22 = vld [vmem:[%s4644_s2] ss:$0 sm:$0xff] }
  0xa2   : > { %3709 = vmatprep.subr.bf16.mxu0 %v4430_v53 }
  0xa5   : > { %3710 = vmatpush3.bf16.msra.mxu0 %v3949_v23 }
  0xa6   : > { %3711 = vmatprep.subr.bf16.mxu0 %v4430_v53 }
  0xa9   : > { %3712 = vmatpush3.bf16.msra.mxu0 %v3952_v24  ;;  %v768_v24 = vstv %s4474_s18  ;;  %s4139_s18 = sshll.u32 %s4211_s17, 4  ;;  %s4140_s18 = int_to_ptr.vmem [resolvable:$false] %s4139_s18 }
  0xaa   : > { %3713 = vmatprep.subr.bf16.mxu0 %v4430_v53  ;;  %s4141_s19 = scalar_lea.vmem %s4140_s18, 512  ;;  %p4142_p11 = scmp.lt.s32.totalorder %s4600_s6, %s4140_s18 }
  0xab   : > { %p4143_p0 = scmp.lt.s32.totalorder %s4141_s19, %s4135_s16 }
  0xad   : > { %3714 = vmatpush3.bf16.msra.mxu0 %v3955_v25  ;;  %p4144_p1 = por %p4143_p0, %p4142_p11 }
  0xae   : > { %3715 = vmatprep.subr.bf16.mxu0 %v4430_v53 }
  0xaf   : > { %p4145_p3 = pnand %p4144_p1, %p4138_p8 }
  0xb1   : > { %3716 = vmatpush3.bf16.msra.mxu0 %v3958_v26  ;;  %v4012_v26 = vld [vmem:[#allocation8 + $0x3b0] sm:$0xff]  }
  0xb2   : > { %3721 = vmatprep.subr.bf16.mxu0 %v4430_v53 }
  0xb4   : > { %3718 = vmatmul.mubr.bf16.vlgmr.msra.gmra.mxu0 %v811_v27 }
  0xb5   : > { %3722 = vmatpush3.bf16.msra.mxu0 %v3961_v28  ;;  %3737 = vmatprep.mubr.msk.bf16.mxu0 %vm4210_vm0, %v4430_v53 }
  0xb6   : > { %3723 = vmatprep.subr.bf16.mxu0 %v4430_v53 }
  0xb9   : > { %3724 = vmatpush3.bf16.msra.mxu0 %v3964_v29 }
  0xba   : > { %3725 = vmatprep.subr.bf16.mxu0 %v4430_v53 }
  0xbd   : > { %3726 = vmatpush3.bf16.msra.mxu0 %v3967_v30 }
  0xbe   : > { %3727 = vmatprep.subr.bf16.mxu0 %v4430_v53 }
  0xc1   : > { %3728 = vmatpush3.bf16.msra.mxu0 %v3970_v31 }
  0xc2   : > { %3729 = vmatprep.subr.bf16.mxu0 %v4430_v53 }
  0xc5   : > { %3730 = vmatpush3.bf16.msra.mxu0 %v3973_v32  ;;  %v4486_v32 = vld [vmem:[#allocation2 + $0x18] sm:$0xff] }
  0xc6   : > { %3731 = vmatprep.subr.bf16.mxu0 %v4430_v53 }
  0xc9   : > { %3732 = vmatpush3.bf16.msra.mxu0 %v3976_v33  ;;  %v860_v33 = vld [vmem:[#allocation2 + $0x48] sm:$0xf8] }
  0xca   : > { %3733 = vmatprep.subr.bf16.mxu0 %v4430_v53 }
  0xcd   : > { %3734 = vmatpush3.bf16.msra.mxu0 %v3979_v34 }
  0xce   : > { %3735 = vmatprep.subr.bf16.mxu0 %v4430_v53 }
  0xd1   : > { %3736 = vmatpush3.bf16.msra.mxu0 %v3982_v38  ;;  %v863_v38 = vld [vmem:[#allocation2 + $0x30] sm:$0x7] }
  0xd2   : > { %3741 = vmatprep.subr.bf16.mxu0 %v4430_v53  ;;  %v869_v42 = vpack.c.bf16 %v863_v38, %v863_v38 }
  0xd4   : > { %3738 = vmatmul.mubr.bf16.vlgmr.msra.gmra.mxu0 %v1504_v51  ;;  %v4021_v51 = vld [vmem:[#allocation8 + $0x398] sm:$0xff]  }
  0xd5   : > { %3742 = vmatpush3.bf16.msra.mxu0 %v3985_v49  ;;  %3757 = vmatprep.mubr.msk.bf16.mxu0 %vm4210_vm0, %v4430_v53  ;;  %v931_v49 = vshrl.u32 %v869_v42, 16 }
  0xd6   : > { %3743 = vmatprep.subr.bf16.mxu0 %v4430_v53 }
  0xd9   : > { %3744 = vmatpush3.bf16.msra.mxu0 %v3988_v52  ;;  %v861_v52 = vld [vmem:[#allocation2] sm:$0xf8] }
  0xda   : > { %3745 = vmatprep.subr.bf16.mxu0 %v4430_v53 }
  0xdd   : > { %3746 = vmatpush3.bf16.msra.mxu0 %v3991_v54 }
  0xde   : > { %3747 = vmatprep.subr.bf16.mxu0 %v4430_v53 }
  0xe1   : > { %3748 = vmatpush3.bf16.msra.mxu0 %v3994_v55 }
  0xe2   : > { %3749 = vmatprep.subr.bf16.mxu0 %v4430_v53 }
  0xe5   : > { %3750 = vmatpush3.bf16.msra.mxu0 %v3997_v59 }
  0xe6   : > { %3751 = vmatprep.subr.bf16.mxu0 %v4430_v53 }
  0xe9   : > { %3752 = vmatpush3.bf16.msra.mxu0 %v4000_v0 }
  0xea   : > { %3753 = vmatprep.subr.bf16.mxu0 %v4430_v53 }
  0xed   : > { %3754 = vmatpush3.bf16.msra.mxu0 %v4003_v2 }
  0xee   : > { %3755 = vmatprep.subr.bf16.mxu0 %v4430_v53 }
  0xf1   : > { %3756 = vmatpush3.bf16.msra.mxu0 %v4006_v9 }
  0xf2   : > { %3761 = vmatprep.subr.bf16.mxu0 %v4430_v53 }
  0xf4   : > { %3758 = vmatmul.mubr.bf16.vlgmr.msra.gmra.mxu0 %v1836_v20 }
  0xf5   : > { %3762 = vmatpush3.bf16.msra.mxu0 %v4009_v17  ;;  %3777 = vmatprep.mubr.msk.bf16.mxu0 %vm4210_vm0, %v4430_v53  ;;  %v4027_v17 = vld [vmem:[#allocation8 + $0x388] sm:$0xff]  }
  0xf6   : > { %3763 = vmatprep.subr.bf16.mxu0 %v4430_v53 }
  0xf9   : > { %3764 = vmatpush3.bf16.msra.mxu0 %v4012_v26 }
  0xfa   : > { %3765 = vmatprep.subr.bf16.mxu0 %v4430_v53 }
 0x10c   : > { %v405_v35 = vpop.f32.mrf.mxu0  ;;  %v479_v36 = vpop.f32.mrf.mxu1 }
 0x10d   : > { %v480_v6 = vadd.f32 %v479_v36, %v405_v35  ;;  %v4015_v35 = vld [vmem:[#allocation8 + $0x3a8] sm:$0xff]  }
 0x10e   : > { %v3623_v37 = vpop.f32.mrf.mxu0  ;;  %v3637_v40 = vpop.f32.mrf.mxu1  ;;  %3766 = vmatpush3.bf16.msra.mxu0 %v4015_v35 }
 0x10f   : > { %v866_v40 = vpack.c.bf16 %v4486_v32, %v860_v33  ;;  %3767 = vmatprep.subr.bf16.mxu0 %v4430_v53 }
 0x110   : > { %v408_v43 = vpop.f32.mrf.mxu0  ;;  %v482_v45 = vpop.f32.mrf.mxu1 }
 0x111   : > { %v483_v14 = vadd.f32 %v482_v45, %v408_v43  ;;  %v4018_v43 = vld [vmem:[#allocation8 + $0x3a0] sm:$0xff]   ;;  %v923_v46 = vshrl.u32 %v866_v40, 16 }
 0x112   : > { %v3624_v47 = vpop.f32.mrf.mxu0  ;;  %v3638_v50 = vpop.f32.mrf.mxu1  ;;  %3768 = vmatpush3.bf16.msra.mxu0 %v4018_v43 }
 0x113   : > { %v926_v47 = vshll.u32 %v866_v40, 16  ;;  %v934_v50 = vshll.u32 %v869_v42, 16  ;;  %3769 = vmatprep.subr.bf16.mxu0 %v4430_v53  ;;  %v925_v54 = vrot.slane %v923_v46, 1  ;;  %v3939_v46 = vld [vmem:[#allocation8 + $0x38] sm:$0xff]  }
 0x116   : > { %3770 = vmatpush3.bf16.msra.mxu0 %v4021_v51 }
 0x117   : > { %3771 = vmatprep.subr.bf16.mxu0 %v4430_v53 }
 0x120   : > { %v567_v56 = vpop.f32.mrf.mxu0  ;;  %v657_v57 = vpop.f32.mrf.mxu1 }
 0x121   : > { %v574_v10 = vadd.f32 %v567_v56, %v480_v6  ;;  %v928_v56 = vrot.slane %v926_v47, 2 }
 0x122   : > { %v3651_v58 = vpop.f32.mrf.mxu0  ;;  %v3665_v60 = vpop.f32.mrf.mxu1 }
 0x123   : > { %v664_v18 = vadd.f32 %v657_v57, %v574_v10  ;;  %v933_v60 = vrot.slane %v931_v49, 1  ;;  %v929_v9 = vor.u32 %v928_v56, %v925_v54  ;;  %v4033_v54 = vld [vmem:[#allocation8 + $0x478] sm:$0xff]  }
 0x124   : > { %v570_v61 = vpop.f32.mrf.mxu0  ;;  %v660_v62 = vpop.f32.mrf.mxu1 }
 0x125   : > { %v575_v19 = vadd.f32 %v570_v61, %v483_v14  ;;  %v936_v61 = vrot.slane %v934_v50, 2 }
 0x126   : > { %v3652_v63 = vpop.f32.mrf.mxu0  ;;  %v3666_v1 = vpop.f32.mrf.mxu1 }
 0x127   : > { %v665_v27 = vadd.f32 %v660_v62, %v575_v19  ;;  %v4024_v63 = vld [vmem:[#allocation8 + $0x390] sm:$0xff]   ;;  %v937_v10 = vor.u32 %v936_v61, %v933_v60 }
 0x128   : > { %3772 = vmatpush3.bf16.msra.mxu0 %v4024_v63  ;;  %v4036_v63 = vld [vmem:[#allocation8 + $0x470] sm:$0xff]  }
 0x129   : > { %3773 = vmatprep.subr.bf16.mxu0 %v4430_v53  ;;  %v938_v38 = vsel %vm921_vm2, %v929_v9, %v937_v10  ;;  %v4045_v9 = vld [vmem:[#allocation8 + $0x458] sm:$0xff]   ;;  %v3954_v10 = vld [vmem:[#allocation8 + $0x10] sm:$0xff]  }
 0x12c   : > { %3774 = vmatpush3.bf16.msra.mxu0 %v4027_v17  ;;  %v1429_v17 = vld [vmem:[#allocation2] sm:$0xc0] }
 0x12d   : > { %3775 = vmatprep.subr.bf16.mxu0 %v4430_v53 }
 0x134   : > { %v747_v21 = vpop.f32.mrf.mxu0 }
 0x135   : > { %v754_v23 = vadd.f32 %v747_v21, %v664_v18 }
 0x136   : > { %v3679_v25 = vpop.f32.mrf.mxu0 }
 0x137   : > { %v763_v28 = vadd.f32 %v3188_v22, %v754_v23 }
 0x138   : > { %v750_v29 = vpop.f32.mrf.mxu0 }
 0x139   : > { %vm766_vm5 = vcmp.ge.f32.partialorder %v763_v28, 0.0  ;;  %v769_v30 = vmul.f32 %v768_v24, %v763_v28  ;;  %v755_v31 = vadd.f32 %v750_v29, %v665_v27 }
 0x13a   : > { %v3680_v34 = vpop.f32.mrf.mxu0 }
 0x13b   : > { %v771_v36 = vsel %vm766_vm5, %v763_v28, %v769_v30  ;;  %v764_v37 = vadd.f32 %v3188_v22, %v755_v31  ;;  %v4030_v30 = vld [vmem:[#allocation8 + $0x380] sm:$0xff]  }
 0x13c   : > { %v794_v39 = vrot.slane %v771_v36, 7  ;;  %v2070_v31 = vld [vmem:[#allocation2 + $0x40] sm:$0xf0]  ;;  %v2073_v36 = vld [vmem:[#allocation2 + $0x58] sm:$0xf]  ;;  %3776 = vmatpush3.bf16.msra.mxu0 %v4030_v30 }
 0x13d   : > { %vm767_vm6 = vcmp.ge.f32.partialorder %v764_v37, 0.0  ;;  %v770_v41 = vmul.f32 %v768_v24, %v764_v37  ;;  %v2079_v40 = vpack.c.bf16 %v2073_v36, %v2073_v36  ;;  %3781 = vmatprep.subr.bf16.mxu0 %v4430_v53  ;;  %v3963_v30 = vld [vmem:[#allocation8 + $0x1b8] sm:$0xff]   ;;  %v3965_v36 = vld [vmem:[#allocation8 + $0x1f0] sm:$0xff]  }
 0x13e   : > { %800 = vst [vmem:[#allocation2 + $0x68] sm:$0xfe] %v794_v39 }
 0x13f   : > { %v772_v44 = vsel %vm767_vm6, %v764_v37, %v770_v41  ;;  %v2076_v37 = vpack.c.bf16 %v4430_v53, %v2070_v31  ;;  %v2143_v47 = vrot.slane %v2079_v40, 2 }
 0x140   : > { %v795_v45 = vrot.slane %v772_v44, 7 }
 0x141   : > { %v2142_v44 = vrot.slane %v2076_v37, 2 }
 0x142   : > { %v796_v48 = vsel %vm793_vm7, %v794_v39, %v795_v45  ;;  %802 = vst [vmem:[#allocation2 + $0x60] sm:$0x1] %v795_v45 }
 0x143   : > { %801 = vst [vmem:[#allocation2 + $0x28] sm:$0xff] %v796_v48 }
 0x145   : > { %v4492_v55 = vld [vmem:[#allocation2 + $0x68] sm:$0xff] }
 0x146   : > { %v1737_v57 = vld [vmem:[#allocation2 + $0x68] sm:$0xfe]  ;;  %v867_v59 = vpack.c.bf16 %v4492_v55, %v861_v52  ;;  %v3941_v52 = vld [vmem:[#allocation8 + $0x70] sm:$0xff]   ;;  %v810_v56 = vpack.c.bf16 %v4492_v55, %v4430_v53 }
 0x147   : > { %v2069_v58 = vld [vmem:[#allocation2 + $0x68] sm:$0xf0]  ;;  %v1746_v62 = vpack.c.bf16 %v796_v48, %v1737_v57  ;;  %v2144_v57 = vsel %vm2135_vm8, %v2142_v44, %v2143_v47 }
 0x148   : > { %v2377_v0 = vld [vmem:[#allocation2 + $0x68] sm:$0x80]  ;;  %v2075_v1 = vpack.c.bf16 %v796_v48, %v2069_v58  ;;  %v940_v2 = vshrl.u32 %v867_v59, 16  ;;  %v943_v3 = vshll.u32 %v867_v59, 16  ;;  %3778 = vmatmul.mubr.bf16.vlgmr.msra.gmra.mxu0 %v2144_v57  ;;  %v3942_v59 = vld [vmem:[#allocation8 + $0x30] sm:$0xff]   ;;  %v3975_v57 = vld [vmem:[#allocation8 + $0x198] sm:$0xff]  }
 0x149   : > { %v1743_v4 = vld [vmem:[#allocation2 + $0x60] sm:$0x1]  ;;  %v1816_v5 = vshll.u32 %v1746_v62, 16  ;;  %v2383_v7 = vpack.c.bf16 %v796_v48, %v2377_v0  ;;  %v1814_v14 = vshrl.u32 %v1746_v62, 16  ;;  %v3944_v62 = vld [vmem:[#allocation8 + $0x68] sm:$0xff]   ;;  %3782 = vmatpush3.bf16.msra.mxu0 %v4033_v54  ;;  %3797 = vmatprep.mubr.msk.bf16.mxu0 %vm4210_vm0, %v4430_v53 }
 0x14a   : > { %v2072_v6 = vld [vmem:[#allocation2 + $0x60] sm:$0xf]  ;;  %v864_v8 = vld [vmem:[#allocation2 + $0x28] sm:$0x7]  ;;  %v1749_v11 = vpack.c.bf16 %v1743_v4, %v1743_v4  ;;  %v2139_v16 = vrot.slane %v2075_v1, 2  ;;  %v942_v18 = vrot.slane %v940_v2, 1  ;;  %3783 = vmatprep.subr.bf16.mxu0 %v4430_v53 }
 0x14b   : > { %v2078_v12 = vpack.c.bf16 %v2072_v6, %v2072_v6  ;;  %v870_v13 = vpack.c.bf16 %v864_v8, %v864_v8  ;;  %v1818_v15 = vrot.slane %v1816_v5, 1  ;;  %v945_v19 = vrot.slane %v943_v3, 2  ;;  %v2380_v22 = vld [vmem:[#allocation2 + $0x60] sm:$0x7f]  ;;  %v3945_v1 = vld [vmem:[#allocation8 + $0x28] sm:$0xff]   ;;  %v3950_v5 = vld [vmem:[#allocation8 + $0x58] sm:$0xff]  }
 0x14c   : > { %v1821_v20 = vshll.u32 %v1749_v11, 16  ;;  %v2456_v25 = vshrl.u32 %v2383_v7, 16  ;;  %v2459_v26 = vshll.u32 %v2383_v7, 16  ;;  %v2386_v33 = vpack.c.bf16 %v2380_v22, %v2380_v22  ;;  %v3947_v2 = vld [vmem:[#allocation8 + $0x60] sm:$0xff]   ;;  %v4039_v3 = vld [vmem:[#allocation8 + $0x468] sm:$0xff]   ;;  %v3951_v7 = vld [vmem:[#allocation8 + $0x18] sm:$0xff]  }
 0x14d   : > { %v2140_v21 = vrot.slane %v2078_v12, 2  ;;  %v948_v23 = vshrl.u32 %v870_v13, 16  ;;  %v951_v24 = vshll.u32 %v870_v13, 16  ;;  %v1819_v27 = vor.u32 %v1818_v15, %v1814_v14  ;;  %3784 = vmatpush3.bf16.msra.mxu0 %v4036_v63  ;;  %v3948_v4 = vld [vmem:[#allocation8 + $0x20] sm:$0xff]   ;;  %v3953_v8 = vld [vmem:[#allocation8 + $0x50] sm:$0xff]   ;;  %v3956_v11 = vld [vmem:[#allocation8 + $0x48] sm:$0xff]  }
 0x14e   : > { %v1823_v28 = vrot.slane %v1821_v20, 1  ;;  %v2464_v41 = vshrl.u32 %v2386_v33, 16  ;;  %v946_v42 = vor.u32 %v945_v19, %v942_v18  ;;  %v2458_v45 = vrot.slane %v2456_v25, 3  ;;  %3785 = vmatprep.subr.bf16.mxu0 %v4430_v53  ;;  %v4042_v6 = vld [vmem:[#allocation8 + $0x460] sm:$0xff]   ;;  %v4048_v12 = vld [vmem:[#allocation8 + $0x450] sm:$0xff]   ;;  %v3957_v13 = vld [vmem:[#allocation8 + $0x8] sm:$0xff]  }
 0x14f   : > { %v4498_v29 = vsel %vm2135_vm8, %v2139_v16, %v2140_v21  ;;  %v950_v34 = vrot.slane %v948_v23, 1  ;;  %v953_v35 = vrot.slane %v951_v24, 2  ;;  %v2461_v48 = vrot.slane %v2459_v26, 4  ;;  %v1432_v14 = vld [vmem:[#allocation2 + $0x28] sm:$0x3f]  ;;  %v3959_v15 = vld [vmem:[#allocation8 + $0x40] sm:$0xff]  }
 0x150   : > { %v4504_v39 = vsel %vm1800_vm4, %v1819_v27, %v1823_v28  ;;  %v2466_v49 = vrot.slane %v2464_v41, 3  ;;  %v2467_v50 = vshll.u32 %v2386_v33, 16  ;;  %v4051_v16 = vld [vmem:[#allocation8 + $0x448] sm:$0xff]   ;;  %v1438_v18 = vpack.c.bf16 %v1432_v14, %v1432_v14  ;;  %v3960_v19 = vld [vmem:[#allocation8] sm:$0xff]   ;;  %v3962_v20 = vld [vmem:[#allocation8 + $0x1f8] sm:$0xff]  }
 0x151   : > { %v954_v43 = vor.u32 %v953_v35, %v950_v34  ;;  %v2462_v60 = vor.u32 %v2461_v48, %v2458_v45  ;;  %3786 = vmatpush3.bf16.msra.mxu0 %v4039_v3  ;;  %v1435_v21 = vpack.c.bf16 %v4492_v55, %v1429_v17  ;;  %v4054_v22 = vld [vmem:[#allocation8 + $0x440] sm:$0xff]   ;;  %v2381_v24 = vld [vmem:[#allocation2 + $0x58] sm:$0x7f]  ;;  %v809_v27 = vpack.c.bf16 %v4486_v32, %v4430_v53  ;;  %v3968_v47 = vld [vmem:[#allocation8 + $0x1e8] sm:$0xff]  }
 0x152   : > { %v2469_v58 = vrot.slane %v2467_v50, 4  ;;  %3787 = vmatprep.subr.bf16.mxu0 %v4430_v53  ;;  %v2378_v23 = vld [vmem:[#allocation2 + $0x40] sm:$0x80]  ;;  %v2387_v26 = vpack.c.bf16 %v2381_v24, %v2381_v24  ;;  %v1500_v28 = vrot.slane %v1438_v18, 3  ;;  %v4060_v50 = vld [vmem:[#allocation8 + $0x530] sm:$0xff]   ;;  %v4063_v54 = vld [vmem:[#allocation8 + $0x528] sm:$0xff]  }
 0x153   : > { %v955_v51 = vsel %vm921_vm2, %v946_v42, %v954_v43  ;;  %v2384_v25 = vpack.c.bf16 %v4430_v53, %v2378_v23  ;;  %v1499_v55 = vrot.slane %v1435_v21, 3  ;;  %v3966_v43 = vld [vmem:[#allocation8 + $0x1b0] sm:$0xff]   ;;  %v1428_v63 = vld [vmem:[#allocation2 + $0x48] sm:$0xc0]  ;;  %v2725_v14 = vld [vmem:[#allocation2 + $0x58] sm:$0xff] }
 0x154   : > { %1152 = vmatprep.mubr.bf16.mxu1 %v955_v51  ;;  %v2470_v61 = vor.u32 %v2469_v58, %v2466_v49  ;;  %v2481_v34 = vshrl.u32 %v2387_v26, 16  ;;  %v2484_v35 = vshll.u32 %v2387_v26, 16  ;;  %v3969_v49 = vld [vmem:[#allocation8 + $0x1a8] sm:$0xff]   ;;  %v3971_v51 = vld [vmem:[#allocation8 + $0x1e0] sm:$0xff]   ;;  %v1434_v3 = vpack.c.bf16 %v4486_v32, %v1428_v63  ;;  %v3990_v24 = vld [vmem:[#allocation8 + $0x270] sm:$0xff]  }
 0x155   : > { %1153 = vmatmul.mubr.bf16.vlgmr.msra.gmra.mxu1 %v938_v38  ;;  %3788 = vmatpush3.bf16.msra.mxu0 %v4042_v6  ;;  %v2473_v31 = vshrl.u32 %v2384_v25, 16  ;;  %v2476_v33 = vshll.u32 %v2384_v25, 16  ;;  %v1501_v42 = vsel %vm1495_vm3, %v1499_v55, %v1500_v28  ;;  %v4066_v58 = vld [vmem:[#allocation8 + $0x520] sm:$0xff]   ;;  %v3992_v25 = vld [vmem:[#allocation8 + $0x2a8] sm:$0xff]  }
 0x156   : > { %3426 = vmatpush3.bf16.msra.mxu1 %v3939_v46  ;;  %1378 = vmatprep.mubr.bf16.mxu1 %v810_v56  ;;  %v4512_v0 = vsel %vm2437_vm9, %v2462_v60, %v2470_v61  ;;  %v2483_v40 = vrot.slane %v2481_v34, 3  ;;  %v2486_v41 = vrot.slane %v2484_v35, 4  ;;  %v4057_v46 = vld [vmem:[#allocation8 + $0x538] sm:$0xff]   ;;  %v3978_v60 = vld [vmem:[#allocation8 + $0x190] sm:$0xff]   ;;  %v3983_v6 = vld [vmem:[#allocation8 + $0x1c0] sm:$0xff]  }
 0x157   : > { %3427 = vmatprep.subr.bf16.mxu1 %v3941_v52  ;;  %3789 = vmatprep.subr.bf16.mxu0 %v4430_v53  ;;  %v2475_v37 = vrot.slane %v2473_v31, 3  ;;  %v2478_v38 = vrot.slane %v2476_v33, 4  ;;  %v3972_v52 = vld [vmem:[#allocation8 + $0x1a0] sm:$0xff]   ;;  %v3974_v56 = vld [vmem:[#allocation8 + $0x1d8] sm:$0xff]  }
 0x158   : > { %v2487_v45 = vor.u32 %v2486_v41, %v2483_v40  ;;  %v4069_v61 = vld [vmem:[#allocation8 + $0x518] sm:$0xff]   ;;  %v4078_v17 = vld [vmem:[#allocation8 + $0x500] sm:$0xff]  }
 0x159   : > { %3790 = vmatpush3.bf16.msra.mxu0 %v4045_v9  ;;  %v2479_v44 = vor.u32 %v2478_v38, %v2475_v37  ;;  %v3996_v33 = vld [vmem:[#allocation8 + $0x260] sm:$0xff]   ;;  %v3998_v34 = vld [vmem:[#allocation8 + $0x298] sm:$0xff]   ;;  %v1742_v37 = vld [vmem:[#allocation2 + $0x8] sm:$0x1] }
 0x15a   : > { %3428 = vmatpush3.bf16.msra.mxu1 %v3942_v59  ;;  %3791 = vmatprep.subr.bf16.mxu0 %v4430_v53  ;;  %v3977_v59 = vld [vmem:[#allocation8 + $0x1d0] sm:$0xff]   ;;  %v3999_v35 = vld [vmem:[#allocation8 + $0x258] sm:$0xff]   ;;  %v1748_v40 = vpack.c.bf16 %v1742_v37, %v1742_v37  ;;  %v4020_v63 = vld [vmem:[#allocation8 + $0x320] sm:$0xff]  }
 0x15b   : > { %3429 = vmatprep.subr.bf16.mxu1 %v3944_v62  ;;  %v2488_v48 = vsel %vm2437_vm9, %v2479_v44, %v2487_v45  ;;  %v3980_v62 = vld [vmem:[#allocation8 + $0x1c8] sm:$0xff]   ;;  %v4002_v38 = vld [vmem:[#allocation8 + $0x250] sm:$0xff]  }
 0x15d   : > { %3792 = vmatpush3.bf16.msra.mxu0 %v4048_v12  ;;  %v3987_v12 = vld [vmem:[#allocation8 + $0x278] sm:$0xff]  }
 0x15e   : > { %3430 = vmatpush3.bf16.msra.mxu1 %v3945_v1  ;;  %3793 = vmatprep.subr.bf16.mxu0 %v4430_v53  ;;  %v1431_v1 = vld [vmem:[#allocation2 + $0x30] sm:$0x3f] }
 0x15f   : > { %3431 = vmatprep.subr.bf16.mxu1 %v3947_v2  ;;  %v3981_v2 = vld [vmem:[#allocation8 + $0x188] sm:$0xff]  }
 0x161   : > { %3794 = vmatpush3.bf16.msra.mxu0 %v4051_v16  ;;  %v3989_v16 = vld [vmem:[#allocation8 + $0x2b0] sm:$0xff]  }
 0x162   : > { %3432 = vmatpush3.bf16.msra.mxu1 %v3948_v4  ;;  %3795 = vmatprep.subr.bf16.mxu0 %v4430_v53  ;;  %v1437_v4 = vpack.c.bf16 %v1431_v1, %v1431_v1 }
 0x163   : > { %3433 = vmatprep.subr.bf16.mxu1 %v3950_v5  ;;  %v4072_v5 = vld [vmem:[#allocation8 + $0x510] sm:$0xff]  }
 0x164   : > { %v1497_v9 = vrot.slane %v1437_v4, 3  ;;  %v4025_v4 = vld [vmem:[#allocation8 + $0x350] sm:$0xff]  }
 0x165   : > { %3796 = vmatpush3.bf16.msra.mxu0 %v4054_v22 }
 0x166   : > { %3434 = vmatpush3.bf16.msra.mxu1 %v3951_v7  ;;  %3801 = vmatprep.subr.bf16.mxu0 %v4430_v53  ;;  %v3984_v7 = vld [vmem:[#allocation8 + $0x180] sm:$0xff]  }
 0x167   : > { %3435 = vmatprep.subr.bf16.mxu1 %v3953_v8  ;;  %v1496_v8 = vrot.slane %v1434_v3, 3  ;;  %v4023_v3 = vld [vmem:[#allocation8 + $0x318] sm:$0xff]  }
 0x168   : > { %3798 = vmatmul.mubr.bf16.vlgmr.msra.gmra.mxu0 %v2488_v48  ;;  %v4008_v48 = vld [vmem:[#allocation8 + $0x240] sm:$0xff]  }
 0x169   : > { %3802 = vmatpush3.bf16.msra.mxu0 %v4057_v46  ;;  %3817 = vmatprep.mubr.msk.bf16.mxu0 %vm4210_vm0, %v4430_v53  ;;  %v1498_v32 = vsel %vm1495_vm3, %v1496_v8, %v1497_v9  ;;  %v1809_v46 = vshll.u32 %v1748_v40, 16  ;;  %v4029_v8 = vld [vmem:[#allocation8 + $0x308] sm:$0xff]  }
 0x16a   : > { %3436 = vmatpush3.bf16.msra.mxu1 %v3954_v10  ;;  %3803 = vmatprep.subr.bf16.mxu0 %v4430_v53  ;;  %v4075_v10 = vld [vmem:[#allocation8 + $0x508] sm:$0xff]  }
 0x16b   : > { %3437 = vmatprep.subr.bf16.mxu1 %v3956_v11  ;;  %v3986_v11 = vld [vmem:[#allocation8 + $0x2b8] sm:$0xff]   ;;  %v4082_v9 = vld [vmem:[#allocation2 + $0x48] sm:$0xff] }
 0x16d   : > { %3804 = vmatpush3.bf16.msra.mxu0 %v4060_v50  ;;  %v4010_v50 = vld [vmem:[#allocation8 + $0x378] sm:$0xff]  }
 0x16e   : > { %3438 = vmatpush3.bf16.msra.mxu1 %v3957_v13  ;;  %3805 = vmatprep.subr.bf16.mxu0 %v4430_v53  ;;  %v2722_v13 = vld [vmem:[#allocation2 + $0x38] sm:$0xfc] }
 0x16f   : > { %3439 = vmatprep.subr.bf16.mxu1 %v3959_v15  ;;  %v2728_v15 = vld [vmem:[#allocation2 + $0x50] sm:$0x3]  ;;  %v2731_v18 = vpack.c.bf16 %v2725_v14, %v2722_v13 }
 0x171   : > { %3806 = vmatpush3.bf16.msra.mxu0 %v4063_v54  ;;  %v2797_v21 = vrot.slane %v2731_v18, 1  ;;  %v4013_v54 = vld [vmem:[#allocation8 + $0x370] sm:$0xff]  }
 0x172   : > { %3440 = vmatpush3.bf16.msra.mxu1 %v3960_v19  ;;  %3807 = vmatprep.subr.bf16.mxu0 %v4430_v53  ;;  %v2734_v19 = vpack.c.bf16 %v2728_v15, %v2728_v15  ;;  %v4034_v15 = vld [vmem:[#allocation8 + $0x438] sm:$0xff]   ;;  %v4037_v18 = vld [vmem:[#allocation8 + $0x430] sm:$0xff]  }
 0x173   : > { %3456 = vmatprep.subr.bf16.mxu1 %v3962_v20  ;;  %v4541_v20 = vpop.f32.mrf.mxu0 }
 0x174   : > { %v2798_v22 = vrot.slane %v2734_v19, 1 }
 0x175   : > { %1379 = vmatmul.mubr.bf16.vlgmr.msra.gmra.mxu1 %v809_v27  ;;  %3808 = vmatpush3.bf16.msra.mxu0 %v4066_v58  ;;  %v3699_v23 = vpop.f32.mrf.mxu0  ;;  %v3993_v27 = vld [vmem:[#allocation8 + $0x268] sm:$0xff]  }
 0x176   : > { %3457 = vmatpush3.bf16.msra.mxu1 %v3963_v30  ;;  %1684 = vmatprep.mubr.bf16.mxu1 %v1501_v42  ;;  %v2799_v26 = vsel %vm2790_vm10, %v2797_v21, %v2798_v22  ;;  %v3995_v30 = vld [vmem:[#allocation8 + $0x2a0] sm:$0xff]   ;;  %v4004_v42 = vld [vmem:[#allocation8 + $0x288] sm:$0xff]   ;;  %v4038_v21 = vld [vmem:[#allocation8 + $0x3f0] sm:$0xff]  }
 0x177   : > { %3458 = vmatprep.subr.bf16.mxu1 %v3965_v36  ;;  %3809 = vmatprep.subr.bf16.mxu0 %v4430_v53  ;;  %v4545_v28 = vpop.f32.mrf.mxu0  ;;  %v4001_v36 = vld [vmem:[#allocation8 + $0x290] sm:$0xff]   ;;  %v4040_v22 = vld [vmem:[#allocation8 + $0x428] sm:$0xff]  }
 0x179   : > { %3810 = vmatpush3.bf16.msra.mxu0 %v4069_v61  ;;  %v3700_v31 = vpop.f32.mrf.mxu0  ;;  %v4019_v61 = vld [vmem:[#allocation8 + $0x360] sm:$0xff]  }
 0x17a   : > { %3459 = vmatpush3.bf16.msra.mxu1 %v3966_v43  ;;  %3811 = vmatprep.subr.bf16.mxu0 %v4430_v53  ;;  %v4005_v43 = vld [vmem:[#allocation8 + $0x248] sm:$0xff]   ;;  %v4046_v31 = vld [vmem:[#allocation8 + $0x418] sm:$0xff]  }
 0x17b   : > { %3460 = vmatprep.subr.bf16.mxu1 %v3968_v47  ;;  %v4007_v47 = vld [vmem:[#allocation8 + $0x280] sm:$0xff]  }
 0x17d   : > { %3812 = vmatpush3.bf16.msra.mxu0 %v4072_v5  ;;  %v4028_v5 = vld [vmem:[#allocation8 + $0x348] sm:$0xff]  }
 0x17e   : > { %3461 = vmatpush3.bf16.msra.mxu1 %v3969_v49  ;;  %3813 = vmatprep.subr.bf16.mxu0 %v4430_v53 }
 0x17f   : > { %3462 = vmatprep.subr.bf16.mxu1 %v3971_v51 }
 0x181   : > { %3814 = vmatpush3.bf16.msra.mxu0 %v4075_v10 }
 0x182   : > { %3463 = vmatpush3.bf16.msra.mxu1 %v3972_v52  ;;  %3815 = vmatprep.subr.bf16.mxu0 %v4430_v53  ;;  %v4011_v52 = vld [vmem:[#allocation8 + $0x338] sm:$0xff]  }
 0x183   : > { %3464 = vmatprep.subr.bf16.mxu1 %v3974_v56  ;;  %v4549_v56 = vpop.f32.mrf.mxu0 }
 0x185   : > { %3816 = vmatpush3.bf16.msra.mxu0 %v4078_v17  ;;  %v3719_v58 = vpop.f32.mrf.mxu0  ;;  %v4035_v17 = vld [vmem:[#allocation8 + $0x3f8] sm:$0xff]  }
 0x186   : > { %3465 = vmatpush3.bf16.msra.mxu1 %v3975_v57  ;;  %v4014_v57 = vld [vmem:[#allocation8 + $0x330] sm:$0xff]  }
 0x187   : > { %3466 = vmatprep.subr.bf16.mxu1 %v3977_v59  ;;  %v4016_v59 = vld [vmem:[#allocation8 + $0x368] sm:$0xff]  }
 0x188   : > { %3818 = vmatmul.mubr.bf16.vlgmr.msra.gmra.mxu0 %v2799_v26 }
 0x18a   : > { %3467 = vmatpush3.bf16.msra.mxu1 %v3978_v60  ;;  %v4017_v60 = vld [vmem:[#allocation8 + $0x328] sm:$0xff]  }
 0x18b   : > { %3468 = vmatprep.subr.bf16.mxu1 %v3980_v62  ;;  %v4552_v62 = vpop.f32.mrf.mxu0 }
 0x18d   : > { %v3720_v1 = vpop.f32.mrf.mxu0 }
 0x18e   : > { %3469 = vmatpush3.bf16.msra.mxu1 %v3981_v2  ;;  %v4022_v2 = vld [vmem:[#allocation8 + $0x358] sm:$0xff]  }
 0x18f   : > { %3470 = vmatprep.subr.bf16.mxu1 %v3983_v6  ;;  %v2068_v6 = vld [vmem:[#allocation2 + $0x18] sm:$0xf0] }
 0x190   : > { %v2074_v10 = vpack.c.bf16 %v4082_v9, %v2068_v6  ;;  %v4059_v1 = vld [vmem:[#allocation8 + $0x4b8] sm:$0xff]  }
 0x192   : > { %3471 = vmatpush3.bf16.msra.mxu1 %v3984_v7  ;;  %v2071_v7 = vld [vmem:[#allocation2 + $0x8] sm:$0xf]  ;;  %v2136_v13 = vrot.slane %v2074_v10, 2  ;;  %v4068_v10 = vld [vmem:[#allocation8 + $0x4a0] sm:$0xff]  }
 0x193   : > { %3487 = vmatprep.subr.bf16.mxu1 %v3986_v11  ;;  %v2077_v11 = vpack.c.bf16 %v2071_v7, %v2071_v7  ;;  %v4065_v7 = vld [vmem:[#allocation8 + $0x4a8] sm:$0xff]  }
 0x194   : > { %v4555_v19 = vpop.f32.mrf.mxu0 }
 0x195   : > { %1685 = vmatmul.mubr.bf16.vlgmr.msra.gmra.mxu1 %v1498_v32  ;;  %v4032_v32 = vld [vmem:[#allocation8 + $0x300] sm:$0xff]   ;;  %v2137_v14 = vrot.slane %v2077_v11, 2 }
 0x196   : > { %3488 = vmatpush3.bf16.msra.mxu1 %v3987_v12  ;;  %2016 = vmatprep.mubr.bf16.mxu1 %v4504_v39  ;;  %v1736_v39 = vld [vmem:[#allocation2 + $0x18] sm:$0xfe]  ;;  %v4031_v12 = vld [vmem:[#allocation8 + $0x340] sm:$0xff]   ;;  %v3739_v23 = vpop.f32.mrf.mxu0 }
 0x197   : > { %3489 = vmatprep.subr.bf16.mxu1 %v3989_v16  ;;  %v1745_v55 = vpack.c.bf16 %v4430_v53, %v1736_v39  ;;  %v1811_v53 = vrot.slane %v1809_v46, 1  ;;  %v2138_v16 = vsel %vm2135_vm8, %v2136_v13, %v2137_v14  ;;  %v4047_v39 = vld [vmem:[#allocation8 + $0x3d8] sm:$0xff]   ;;  %v4073_v13 = vld [vmem:[#allocation8 + $0x4d0] sm:$0xff]  }
 0x198   : > { %v4558_v26 = vpop.f32.mrf.mxu0  ;;  %v4074_v14 = vld [vmem:[#allocation8 + $0x490] sm:$0xff]  }
 0x199   : > { %v1804_v41 = vshll.u32 %v1745_v55, 16  ;;  %v1802_v44 = vshrl.u32 %v1745_v55, 16  ;;  %v4049_v55 = vld [vmem:[#allocation8 + $0x410] sm:$0xff]  }
 0x19a   : > { %3490 = vmatpush3.bf16.msra.mxu1 %v3990_v24  ;;  %v4041_v24 = vld [vmem:[#allocation8 + $0x3e8] sm:$0xff]  }
 0x19b   : > { %3491 = vmatprep.subr.bf16.mxu1 %v3992_v25  ;;  %v1806_v45 = vrot.slane %v1804_v41, 1  ;;  %v4043_v25 = vld [vmem:[#allocation8 + $0x420] sm:$0xff]  }
 0x19d   : > { %v1807_v49 = vor.u32 %v1806_v45, %v1802_v44  ;;  %v2727_v44 = vld [vmem:[#allocation2 + $0x10] sm:$0x3]  ;;  %v4053_v45 = vld [vmem:[#allocation8 + $0x3c8] sm:$0xff]  }
 0x19e   : > { %3492 = vmatpush3.bf16.msra.mxu1 %v3993_v27  ;;  %v4044_v27 = vld [vmem:[#allocation8 + $0x3e0] sm:$0xff]  }
 0x19f   : > { %3493 = vmatprep.subr.bf16.mxu1 %v3995_v30  ;;  %v1812_v51 = vsel %vm1800_vm4, %v1807_v49, %v1811_v53  ;;  %v3740_v30 = vpop.f32.mrf.mxu0  ;;  %v2724_v53 = vld [vmem:[#allocation2 + $0x60] sm:$0xff] }
 0x1a2   : > { %3494 = vmatpush3.bf16.msra.mxu1 %v3996_v33  ;;  %v2376_v33 = vld [vmem:[#allocation2 + $0x18] sm:$0x80] }
 0x1a3   : > { %3495 = vmatprep.subr.bf16.mxu1 %v3998_v34  ;;  %v2379_v34 = vld [vmem:[#allocation2 + $0x8] sm:$0x7f] }
 0x1a6   : > { %3496 = vmatpush3.bf16.msra.mxu1 %v3999_v35  ;;  %v2385_v35 = vpack.c.bf16 %v2379_v34, %v2379_v34 }
 0x1a7   : > { %3497 = vmatprep.subr.bf16.mxu1 %v4001_v36  ;;  %v4050_v36 = vld [vmem:[#allocation8 + $0x3d0] sm:$0xff]  }
 0x1a8   : > { %v2447_v40 = vshrl.u32 %v2385_v35, 16  ;;  %v2450_v41 = vshll.u32 %v2385_v35, 16 }
 0x1aa   : > { %3498 = vmatpush3.bf16.msra.mxu1 %v4002_v38  ;;  %v2452_v49 = vrot.slane %v2450_v41, 4 }
 0x1ab   : > { %3499 = vmatprep.subr.bf16.mxu1 %v4004_v42  ;;  %v4052_v42 = vld [vmem:[#allocation8 + $0x408] sm:$0xff]  }
 0x1ae   : > { %3500 = vmatpush3.bf16.msra.mxu1 %v4005_v43  ;;  %v2721_v43 = vld [vmem:[#allocation2 + $0x28] sm:$0xfc] }
 0x1af   : > { %3501 = vmatprep.subr.bf16.mxu1 %v4007_v47 }
 0x1b2   : > { %3502 = vmatpush3.bf16.msra.mxu1 %v4008_v48  ;;  %v2449_v48 = vrot.slane %v2447_v40, 3 }
 0x1b3   : > { %3518 = vmatprep.subr.bf16.mxu1 %v4010_v50  ;;  %v4055_v50 = vld [vmem:[#allocation8 + $0x400] sm:$0xff]  }
 0x1b4   : > { %v2453_v58 = vor.u32 %v2452_v49, %v2449_v48 }
 0x1b5   : > { %2017 = vmatmul.mubr.bf16.vlgmr.msra.gmra.mxu1 %v1812_v51  ;;  %v2730_v51 = vpack.c.bf16 %v2724_v53, %v2721_v43 }
 0x1b6   : > { %3519 = vmatpush3.bf16.msra.mxu1 %v4011_v52  ;;  %2324 = vmatprep.mubr.bf16.mxu1 %v4498_v29  ;;  %v4026_v29 = vld [vmem:[#allocation8 + $0x310] sm:$0xff]   ;;  %v2733_v52 = vpack.c.bf16 %v2727_v44, %v2727_v44 }
 0x1b7   : > { %3520 = vmatprep.subr.bf16.mxu1 %v4013_v54  ;;  %v4056_v54 = vld [vmem:[#allocation8 + $0x3c0] sm:$0xff]  }
 0x1ba   : > { %3521 = vmatpush3.bf16.msra.mxu1 %v4014_v57 }
 0x1bb   : > { %3522 = vmatprep.subr.bf16.mxu1 %v4016_v59  ;;  %v4058_v59 = vld [vmem:[#allocation8 + $0x4f8] sm:$0xff]  }
 0x1be   : > { %3523 = vmatpush3.bf16.msra.mxu1 %v4017_v60  ;;  %v2794_v60 = vrot.slane %v2730_v51, 1 }
 0x1bf   : > { %3524 = vmatprep.subr.bf16.mxu1 %v4019_v61  ;;  %v2795_v61 = vrot.slane %v2733_v52, 1 }
 0x1c2   : > { %3525 = vmatpush3.bf16.msra.mxu1 %v4020_v63 }
 0x1c3   : > { %3526 = vmatprep.subr.bf16.mxu1 %v4022_v2  ;;  %v4061_v2 = vld [vmem:[#allocation8 + $0x4f0] sm:$0xff]  }
 0x1c6   : > { %3527 = vmatpush3.bf16.msra.mxu1 %v4023_v3  ;;  %v2796_v3 = vsel %vm2790_vm10, %v2794_v60, %v2795_v61 }
 0x1c7   : > { %3528 = vmatprep.subr.bf16.mxu1 %v4025_v4  ;;  %v4562_v4 = vpop.f32.mrf.mxu0 }
 0x1c9   : > { %v3759_v6 = vpop.f32.mrf.mxu0 }
 0x1ca   : > { %3529 = vmatpush3.bf16.msra.mxu1 %v4026_v29  ;;  %v4062_v29 = vld [vmem:[#allocation8 + $0x4b0] sm:$0xff]  }
 0x1cb   : > { %3530 = vmatprep.subr.bf16.mxu1 %v4028_v5  ;;  %v4064_v5 = vld [vmem:[#allocation8 + $0x4e8] sm:$0xff]  }
 0x1ce   : > { %3531 = vmatpush3.bf16.msra.mxu1 %v4029_v8  ;;  %v4067_v8 = vld [vmem:[#allocation8 + $0x4e0] sm:$0xff]  }
 0x1cf   : > { %3532 = vmatprep.subr.bf16.mxu1 %v4031_v12  ;;  %v4070_v12 = vld [vmem:[#allocation8 + $0x4d8] sm:$0xff]  }
 0x1d2   : > { %3533 = vmatpush3.bf16.msra.mxu1 %v4032_v32  ;;  %v4071_v32 = vld [vmem:[#allocation8 + $0x498] sm:$0xff]  }
 0x1d3   : > { %3549 = vmatprep.subr.bf16.mxu1 %v4034_v15  ;;  %v4076_v15 = vld [vmem:[#allocation8 + $0x4c8] sm:$0xff]  }
 0x1d5   : > { %2325 = vmatmul.mubr.bf16.vlgmr.msra.gmra.mxu1 %v2138_v16  ;;  %v2720_v16 = vld [vmem:[#allocation2 + $0x30] sm:$0xfc] }
 0x1d6   : > { %3550 = vmatpush3.bf16.msra.mxu1 %v4035_v17  ;;  %2668 = vmatprep.mubr.bf16.mxu1 %v4512_v0  ;;  %v2382_v0 = vpack.c.bf16 %v4082_v9, %v2376_v33  ;;  %v4564_v9 = vpop.f32.mrf.mxu0  ;;  %v2723_v17 = vld [vmem:[#allocation2 + $0x8] sm:$0xff] }
 0x1d7   : > { %3551 = vmatprep.subr.bf16.mxu1 %v4037_v18  ;;  %v2726_v18 = vld [vmem:[#allocation2 + $0x20] sm:$0x3] }
 0x1d8   : > { %v2439_v37 = vshrl.u32 %v2382_v0, 16  ;;  %v2442_v38 = vshll.u32 %v2382_v0, 16  ;;  %v3760_v11 = vpop.f32.mrf.mxu0  ;;  %v2732_v23 = vpack.c.bf16 %v2726_v18, %v2726_v18 }
 0x1da   : > { %3552 = vmatpush3.bf16.msra.mxu1 %v4038_v21  ;;  %v2441_v46 = vrot.slane %v2439_v37, 3  ;;  %v2444_v47 = vrot.slane %v2442_v38, 4  ;;  %v4077_v21 = vld [vmem:[#allocation8 + $0x488] sm:$0xff]   ;;  %v2792_v30 = vrot.slane %v2732_v23, 1 }
 0x1db   : > { %3553 = vmatprep.subr.bf16.mxu1 %v4040_v22  ;;  %v2729_v22 = vpack.c.bf16 %v2723_v17, %v2720_v16 }
 0x1dc   : > { %v2445_v57 = vor.u32 %v2444_v47, %v2441_v46 }
 0x1de   : > { %3554 = vmatpush3.bf16.msra.mxu1 %v4041_v24  ;;  %v2454_v63 = vsel %vm2437_vm9, %v2445_v57, %v2453_v58  ;;  %v4079_v24 = vld [vmem:[#allocation8 + $0x4c0] sm:$0xff]  }
 0x1df   : > { %3555 = vmatprep.subr.bf16.mxu1 %v4043_v25  ;;  %v4080_v25 = vld [vmem:[#allocation8 + $0x480] sm:$0xff]  }
 0x1e2   : > { %3556 = vmatpush3.bf16.msra.mxu1 %v4044_v27  ;;  %v2791_v27 = vrot.slane %v2729_v22, 1 }
 0x1e3   : > { %3557 = vmatprep.subr.bf16.mxu1 %v4046_v31 }
 0x1e4   : > { %v2793_v31 = vsel %vm2790_vm10, %v2791_v27, %v2792_v30 }
 0x1e6   : > { %3558 = vmatpush3.bf16.msra.mxu1 %v4047_v39 }
 0x1e7   : > { %3559 = vmatprep.subr.bf16.mxu1 %v4049_v55 }
 0x1ea   : > { %3560 = vmatpush3.bf16.msra.mxu1 %v4050_v36 }
 0x1eb   : > { %3561 = vmatprep.subr.bf16.mxu1 %v4052_v42 }
 0x1ee   : > { %3562 = vmatpush3.bf16.msra.mxu1 %v4053_v45 }
 0x1ef   : > { %3563 = vmatprep.subr.bf16.mxu1 %v4055_v50 }
 0x1f2   : > { %3564 = vmatpush3.bf16.msra.mxu1 %v4056_v54 }
 0x1f3   : > { %3580 = vmatprep.subr.bf16.mxu1 %v4058_v59 }
 0x1f5   : > { %2669 = vmatmul.mubr.bf16.vlgmr.msra.gmra.mxu1 %v2454_v63 }
 0x1f6   : > { %3581 = vmatpush3.bf16.msra.mxu1 %v4059_v1  ;;  %2979 = vmatprep.mubr.bf16.mxu1 %v2796_v3 }
 0x1f7   : > { %3582 = vmatprep.subr.bf16.mxu1 %v4061_v2 }
 0x1fa   : > { %3583 = vmatpush3.bf16.msra.mxu1 %v4062_v29 }
 0x1fb   : > { %3584 = vmatprep.subr.bf16.mxu1 %v4064_v5 }
 0x1fe   : > { %3585 = vmatpush3.bf16.msra.mxu1 %v4065_v7 }
 0x1ff   : > { %3586 = vmatprep.subr.bf16.mxu1 %v4067_v8 }
 0x202   : > { %3587 = vmatpush3.bf16.msra.mxu1 %v4068_v10 }
 0x203   : > { %3588 = vmatprep.subr.bf16.mxu1 %v4070_v12 }
 0x206   : > { %3589 = vmatpush3.bf16.msra.mxu1 %v4071_v32 }
 0x207   : > { %3590 = vmatprep.subr.bf16.mxu1 %v4073_v13 }
 0x208   : > { %v2367_v33 = vpop.f32.mrf.mxu0 }
 0x20a   : > { %3591 = vmatpush3.bf16.msra.mxu1 %v4074_v14  ;;  %v3779_v34 = vpop.f32.mrf.mxu0 }
 0x20b   : > { %3592 = vmatprep.subr.bf16.mxu1 %v4076_v15 }
 0x20c   : > { %v4567_v39 = vpop.f32.mrf.mxu0 }
 0x20e   : > { %3593 = vmatpush3.bf16.msra.mxu1 %v4077_v21  ;;  %v3780_v0 = vpop.f32.mrf.mxu0 }
 0x20f   : > { %3594 = vmatprep.subr.bf16.mxu1 %v4079_v24 }
 0x212   : > { %3595 = vmatpush3.bf16.msra.mxu1 %v4080_v25 }
 0x215   : > { %2980 = vmatmul.mubr.bf16.vlgmr.msra.gmra.mxu1 %v2793_v31  ;;  %v3410_v43 = vpop.f32.mrf.mxu1 }
 0x217   : > { %v3411_v44 = vpop.f32.mrf.mxu1 }
 0x218   : > { %v3412_v29 = vadd.f32 %v3411_v44, %v3410_v43 }
 0x219   : > { %v3413_v45 = vpop.f32.mrf.mxu1 }
 0x21a   : > { %v1196_v8 = vadd.f32 %v3412_v29, %v4541_v20 }
 0x21b   : > { %v3414_v46 = vpop.f32.mrf.mxu1 }
 0x21c   : > { %v3415_v6 = vadd.f32 %v3414_v46, %v3413_v45 }
 0x21e   : > { %v1199_v13 = vadd.f32 %v3415_v6, %v4545_v28 }
 0x228   : > { %v2711_v35 = vpop.f32.mrf.mxu0 }
 0x22a   : > { %v3799_v55 = vpop.f32.mrf.mxu0 }
 0x22c   : > { %v4569_v36 = vpop.f32.mrf.mxu0 }
 0x22e   : > { %v3800_v37 = vpop.f32.mrf.mxu0 }
 0x235   : > { %v3441_v47 = vpop.f32.mrf.mxu1 }
 0x237   : > { %v3442_v48 = vpop.f32.mrf.mxu1 }
 0x238   : > { %v3443_v5 = vadd.f32 %v3442_v48, %v3441_v47 }
 0x239   : > { %v3444_v49 = vpop.f32.mrf.mxu1 }
 0x23a   : > { %v1381_v12 = vadd.f32 %v3443_v5, %v1196_v8 }
 0x23b   : > { %v3445_v53 = vpop.f32.mrf.mxu1 }
 0x23c   : > { %v3446_v11 = vadd.f32 %v3445_v53, %v3444_v49  ;;  %v1422_v21 = vadd.f32 %v4549_v56, %v1381_v12 }
 0x23e   : > { %v1384_v18 = vadd.f32 %v3446_v11, %v1199_v13 }
 0x240   : > { %v1425_v28 = vadd.f32 %v4552_v62, %v1384_v18 }
 0x248   : > { %v4571_v38 = vpop.f32.mrf.mxu0 }
 0x24a   : > { %v3819_v40 = vpop.f32.mrf.mxu0 }
 0x24c   : > { %v4573_v41 = vpop.f32.mrf.mxu0 }
 0x24e   : > { %v3820_v42 = vpop.f32.mrf.mxu0 }
 0x255   : > { %v3472_v50 = vpop.f32.mrf.mxu1 }
 0x257   : > { %v3473_v51 = vpop.f32.mrf.mxu1 }
 0x258   : > { %v3474_v10 = vadd.f32 %v3473_v51, %v3472_v50 }
 0x259   : > { %v3475_v52 = vpop.f32.mrf.mxu1 }
 0x25a   : > { %v1728_v15 = vadd.f32 %v3474_v10, %v4555_v19 }
 0x25b   : > { %v3476_v54 = vpop.f32.mrf.mxu1 }
 0x25c   : > { %v3477_v16 = vadd.f32 %v3476_v54, %v3475_v52  ;;  %v1734_v20 = vadd.f32 %v1728_v15, %v1422_v21 }
 0x25e   : > { %v1731_v27 = vadd.f32 %v3477_v16, %v4558_v26 }
 0x260   : > { %v1735_v37 = vadd.f32 %v1731_v27, %v1425_v28 }
 0x275   : > { %v3503_v57 = vpop.f32.mrf.mxu1 }
 0x277   : > { %v3504_v58 = vpop.f32.mrf.mxu1 }
 0x278   : > { %v3505_v32 = vadd.f32 %v3504_v58, %v3503_v57 }
 0x279   : > { %v3506_v59 = vpop.f32.mrf.mxu1 }
 0x27a   : > { %v2060_v22 = vadd.f32 %v3505_v32, %v4562_v4 }
 0x27b   : > { %v3507_v60 = vpop.f32.mrf.mxu1 }
 0x27c   : > { %v3508_v23 = vadd.f32 %v3507_v60, %v3506_v59  ;;  %v2066_v19 = vadd.f32 %v2060_v22, %v1734_v20 }
 0x27e   : > { %v2063_v0 = vadd.f32 %v3508_v23, %v4564_v9  ;;  %v3357_v9 = vld [vmem:[%s4647_s5] ss:$0 sm:$0xff] }
 0x280   : > { %v2067_v43 = vadd.f32 %v2063_v0, %v1735_v37 }
 0x295   : > { %v3534_v61 = vpop.f32.mrf.mxu1 }
 0x297   : > { %v3535_v63 = vpop.f32.mrf.mxu1 }
 0x298   : > { %v3536_v17 = vadd.f32 %v3535_v63, %v3534_v61 }
 0x299   : > { %v3537_v1 = vpop.f32.mrf.mxu1 }
 0x29a   : > { %v2368_v30 = vadd.f32 %v3536_v17, %v2367_v33 }
 0x29b   : > { %v3538_v2 = vpop.f32.mrf.mxu1 }
 0x29c   : > { %v3539_v31 = vadd.f32 %v3538_v2, %v3537_v1  ;;  %v2374_v40 = vadd.f32 %v2368_v30, %v2066_v19 }
 0x29e   : > { %v2371_v42 = vadd.f32 %v3539_v31, %v4567_v39  ;;  %v3043_v39 = vstv %s4582_s21 }
 0x2a0   : > { %v2375_v46 = vadd.f32 %v2371_v42, %v2067_v43 }
 0x2b5   : > { %v3565_v3 = vpop.f32.mrf.mxu1 }
 0x2b7   : > { %v3566_v7 = vpop.f32.mrf.mxu1 }
 0x2b8   : > { %v3567_v24 = vadd.f32 %v3566_v7, %v3565_v3 }
 0x2b9   : > { %v3568_v14 = vpop.f32.mrf.mxu1 }
 0x2ba   : > { %v2712_v56 = vadd.f32 %v3567_v24, %v2711_v35 }
 0x2bb   : > { %v3569_v25 = vpop.f32.mrf.mxu1 }
 0x2bc   : > { %v3570_v55 = vadd.f32 %v3569_v25, %v3568_v14  ;;  %v2718_v44 = vadd.f32 %v2712_v56, %v2374_v40 }
 0x2be   : > { %v2715_v62 = vadd.f32 %v3570_v55, %v4569_v36 }
 0x2c0   : > { %v2719_v49 = vadd.f32 %v2715_v62, %v2375_v46 }
 0x2d5   : > { %v3596_v34 = vpop.f32.mrf.mxu1 }
 0x2d7   : > { %v3597_v4 = vpop.f32.mrf.mxu1 }
 0x2d8   : > { %v3598_v26 = vadd.f32 %v3597_v4, %v3596_v34 }
 0x2d9   : > { %v3599_v33 = vpop.f32.mrf.mxu1 }
 0x2da   : > { %v3023_v45 = vadd.f32 %v3598_v26, %v4571_v38 }
 0x2db   : > { %v3600_v35 = vpop.f32.mrf.mxu1 }
 0x2dc   : > { %v3029_v47 = vadd.f32 %v3023_v45, %v2718_v44  ;;  %v3601_v48 = vadd.f32 %v3600_v35, %v3599_v33 }
 0x2de   : > { %v3038_v53 = vadd.f32 %v3357_v9, %v3029_v47  ;;  %v3026_v50 = vadd.f32 %v3601_v48, %v4573_v41 }
 0x2e0   : > { %vm3041_vm11 = vcmp.ge.f32.partialorder %v3038_v53, 0.0  ;;  %v3044_v36 = vmul.f32 %v3043_v39, %v3038_v53  ;;  %v3030_v51 = vadd.f32 %v3026_v50, %v2719_v49 }
 0x2e2   : > { %v3046_v38 = vsel %vm3041_vm11, %v3038_v53, %v3044_v36  ;;  %v3039_v52 = vadd.f32 %v3357_v9, %v3030_v51 }
 0x2e3   : > { %3048 = vst [vmem:[%s303_s27] sm:$0xff] %v3046_v38 }
 0x2e4   : > { %vm3042_vm12 = vcmp.ge.f32.partialorder %v3039_v52, 0.0  ;;  %v3045_v54 = vmul.f32 %v3043_v39, %v3039_v52 }
 0x2e6   : > { %v3047_v41 = vsel %vm3042_vm12, %v3039_v52, %v3045_v54 }
 0x2e7   : > { %3049 = vst [vmem:[%s303_s27 + $0x8] sm:$0xff] %v3047_v41 }
 0x2e8   : > { %4148 = shalt.err (!%p4145_p3)
}
 0x2e9   : > { %s4149_s20 = scalar_lea.hbm %s4598_s15, 256  ;;  %s4153_s23 = scalar_lea.hbm %s4649_s7, 512 }
 0x2ea   : > { %p4150_p2 = scmp.ne.s32.totalorder %s4598_s15, %s4149_s20  ;;  %p4154_p7 = scmp.lt.s32.totalorder %s4598_s15, %s4649_s7 }
 0x2eb   : > { %p4155_p6 = scmp.lt.s32.totalorder %s4153_s23, %s4149_s20 }
 0x2ec   : > { %p4151_p4 = pnand %p4150_p2, %p4298_p5 }
 0x2ed   : > { %p4156_p9 = por %p4155_p6, %p4154_p7 }
 0x2ee   : > { %p4152_p13 = pneg %p4151_p4 }
 0x2f0   : > { %p4157_p10 = pnand %p4156_p9, %p4152_p13 }
 0x2f2   : > { %4160 = shalt.err (!%p4157_p10)
}
 0x2f3   : > { %s4212_s26 = smov 128   ;;  %s4213_s27 = smov 8  }
 0x2f4   : > { %3830 = dma.vmem_to_hbm [thread:$0]  (%p4298_p5), %s4600_s6, 256, %s4598_s15, %s4602_s3, %s4212_s26, %s4212_s26, %s4213_s27  }
 0x2f5 PF: > { %p3847_p12 = scmp.ge.s32.totalorder %s4203_s8, 2  ;;  %s3079_s10 = sand.u32 1, %s4191_s28  }
 0x2f6   : > { %p4659_p8 = scmp.ne.s32.totalorder %s4652_s14, 0  ;;  %s3080_s11 = scalar_lea.sflag [#allocation7], %s3079_s10 }
 0x2f8   : > { %p3840_p11 = pnand %p3847_p12, %p4659_p8 }
 0x2fa   : > { %p3841_p0 = pneg %p3840_p11 }
 0x2fc   : > { %4186 = dma.done.wait (%p3841_p0), %s3080_s11, 256  }
 0x2fd   : > { %4188 = vsyncadd (%p3841_p0), %s3080_s11, 4294967040  ;;  %p21_p1 = scmp.ge.s32.totalorder %s4285_s9, 4   ;;  %s4660_s28 = smov %s4195_s29 }
 0x2fe   : > { %s4661_s29 = smov %s4199_s30  ;;  %s4662_s30 = smov %s4296_s12 }
 0x2ff   : > { %s4663_s8 = smov %s4285_s9  ;;  %23 = sbr.rel (!%p21_p1) target bundleno = 8 (0x8), region = 102 }
 0x304   :  { %3085 = vsyncpa [#allocation6], 1 }
 0x305   :  { %3087 = vsyncpa [#allocation6 + $0x1], 1 }
 0x306   :  { %3088 = vsyncpa [#allocation9], 1 }
 0x307   :  { %3089 = vsyncpa [#allocation7], 1 }
 0x308   :  { %3091 = vsyncpa [#allocation7 + $0x1], 1 }

</bundles_post_ra>
